<compile_context>
chip_gen: v5e
topology: v5e:2x2
jax: 0.10.0
libtpu: 0.0.40
codegen_flags: <defaults>
</compile_context>

<pallas_src>
import functools
import math

import jax
import jax.numpy as jnp
from jax import lax
from jax.experimental import pallas as pl
from jax.experimental.pallas import tpu as pltpu


MATMUL_DTYPE = jnp.bfloat16        # MXU-native input dtype; accumulation stays f32
NEG_INF = jnp.float32(-1e30)       # large finite negative (safe under f32 arithmetic)


# ----------------------------- in-kernel helpers -----------------------------

def _layernorm(v, g, b, eps=1e-5):
    mu = jnp.mean(v, axis=-1, keepdims=True)
    var = jnp.mean(jnp.square(v - mu), axis=-1, keepdims=True)
    return (v - mu) * lax.rsqrt(var + eps) * g + b


def _gelu_tanh(x):
    # TODO(synk): torch nn.GELU defaults to exact erf; tanh approx (~1e-3 rel delta) keeps
    # the transcendental on the EUP and avoids depending on an erf Mosaic lowering.
    c = 0.7978845608028654  # sqrt(2/pi)
    return 0.5 * x * (1.0 + jnp.tanh(c * (x + 0.044715 * x * x * x)))


def _softmax_rows(s):
    s = s - jnp.max(s, axis=-1, keepdims=True)
    e = jnp.exp(s)
    return e * pl.reciprocal(jnp.sum(e, axis=-1, keepdims=True), approx=True)


# --------------------------- per-layer (gridded) kernel ---------------------------

def _layer_kernel(h0_ref, mask_ref,
                  ln1g_ref, ln1b_ref, wqkv_ref, bqkv_ref, wo_ref, bo_ref,
                  ln2g_ref, ln2b_ref, w1_ref, b1_ref, w2_ref, b2_ref,
                  lnfg_ref, lnfb_ref, proj_ref,
                  out_ref, feats_ref,
                  x_scr,
                  *, num_layers, num_heads, batch, seq_len):
    li = pl.program_id(0)
    B, L, H = batch, seq_len, num_heads
    BLp, D = x_scr.shape
    Hd = D // H
    scale = 1.0 / math.sqrt(Hd)

    @pl.when(li == 0)
    def _():
        x_scr[...] = h0_ref[...]            # load initial hidden states once

    x = x_scr[...]                          # (BLp, D) f32 residual stream (persistent)
    mask = mask_ref[...]                    # (BLp, BLp) additive mask (resident)

    # ---- multi-head self-attention (pre-LN ResidualAttentionBlock) ----
    xln = _layernorm(x, ln1g_ref[...], ln1b_ref[...])
    qkv = jnp.dot(xln.astype(MATMUL_DTYPE), wqkv_ref[...],
                  preferred_element_type=jnp.float32) + bqkv_ref[...]       # (BLp, 3D)

    ctx_parts = []
    for h in range(H):                      # per-head: 2-D matmuls only, one score tile at a time
        q_h = qkv[:, h * Hd:(h + 1) * Hd].astype(MATMUL_DTYPE)
        k_h = qkv[:, D + h * Hd:D + (h + 1) * Hd].astype(MATMUL_DTYPE)
        v_h = qkv[:, 2 * D + h * Hd:2 * D + (h + 1) * Hd].astype(MATMUL_DTYPE)
        s_h = lax.dot_general(q_h, k_h, (((1,), (1,)), ((), ())),
                              preferred_element_type=jnp.float32) * scale + mask
        p_h = _softmax_rows(s_h)                                           # f32
        ctx_parts.append(jnp.dot(p_h.astype(MATMUL_DTYPE), v_h,
                                 preferred_element_type=jnp.float32))      # (BLp, Hd)
    ctx = jnp.concatenate(ctx_parts, axis=-1)                              # (BLp, D)
    attn = jnp.dot(ctx.astype(MATMUL_DTYPE), wo_ref[...],
                   preferred_element_type=jnp.float32) + bo_ref[...]       # dense out-proj
    x = x + attn

    # ---- MLP: Linear(D,4D) -> GELU -> Linear(4D,D) ----
    xln2 = _layernorm(x, ln2g_ref[...], ln2b_ref[...])
    mid = jnp.dot(xln2.astype(MATMUL_DTYPE), w1_ref[...],
                  preferred_element_type=jnp.float32) + b1_ref[...]
    mid = _gelu_tanh(mid)
    mlp = jnp.dot(mid.astype(MATMUL_DTYPE), w2_ref[...],
                  preferred_element_type=jnp.float32) + b2_ref[...]
    x = x + mlp

    # ---- carry residual to next grid step + per-layer CLS features (post-block,
    #      == hidden_states[-1, :, :] in torch seq-first layout) ----
    x_scr[...] = x
    cls = jnp.concatenate([x[(b + 1) * L - 1:(b + 1) * L, :] for b in range(B)], axis=0)
    feats_ref[...] = cls                                                   # one (B, D) block

    # ---- fused epilogue on the last layer: ln_final(pooled CLS) @ text_projection ----
    @pl.when(li == num_layers - 1)
    def _():
        pooled = _layernorm(cls, lnfg_ref[...], lnfb_ref[...])
        out_ref[...] = jnp.dot(pooled.astype(MATMUL_DTYPE), proj_ref[...],
                               preferred_element_type=jnp.float32).astype(out_ref.dtype)


# ----------------------- host-side parameter re-layout (glue) -----------------------

def _pack_params(params):
    """Stack torch-style per-layer weights along a leading layer axis (streamed by the
    layer grid); big matmul weights cast to bf16, biases/gains kept f32 as (NL,1,·)."""
    layers = params['layers']
    NL = len(layers)
    D = layers[0]['w_qkv'].shape[0]
    Fh = layers[0]['w_fc1'].shape[1]

    def stack(key):
        return jnp.stack([lp[key] for lp in layers], axis=0)

    return {
        'ln1_g': stack('ln1_g').reshape(NL, 1, D),
        'ln1_b': stack('ln1_b').reshape(NL, 1, D),
        'w_qkv': stack('w_qkv').astype(MATMUL_DTYPE),      # (NL, D, 3D)
        'b_qkv': stack('b_qkv').reshape(NL, 1, 3 * D),
        'w_o': stack('w_o').astype(MATMUL_DTYPE),          # (NL, D, D)
        'b_o': stack('b_o').reshape(NL, 1, D),
        'ln2_g': stack('ln2_g').reshape(NL, 1, D),
        'ln2_b': stack('ln2_b').reshape(NL, 1, D),
        'w_fc1': stack('w_fc1').astype(MATMUL_DTYPE),      # (NL, D, F)
        'b_fc1': stack('b_fc1').reshape(NL, 1, Fh),
        'w_fc2': stack('w_fc2').astype(MATMUL_DTYPE),      # (NL, F, D)
        'b_fc2': stack('b_fc2').reshape(NL, 1, D),
    }


# --------------------------------- forward (glue) ---------------------------------

def text_encoder_zs_forward(input_ids, params, *, embed_cls=True, pad_id=0, num_heads=4):
    if embed_cls:
        input_ids = input_ids[:, :-1]                     # drop last token
    B, Lm = input_ids.shape
    L = Lm + 1                                            # +1 for appended CLS embedding
    tok = params['token_embedding']
    pos = params['positional_embedding']
    D = tok.shape[1]
    P = params['text_projection'].shape[1]
    NL = len(params['layers'])
    Fh = params['layers'][0]['w_fc1'].shape[1]
    H = num_heads
    Hd = D // H
    assert pos.shape[0] >= L, "positional_embedding shorter than sequence length"

    # token embedding + CLS append + positional embedding (glue)
    h = jnp.take(tok, input_ids, axis=0)                                   # (B, Lm, D)
    cls_tok = jnp.broadcast_to(params['cls_emb'][None, None, :], (B, 1, D))
    h = jnp.concatenate([h, cls_tok], axis=1)                              # (B, L, D)
    h = (h + pos[:L][None, :, :]).astype(jnp.float32)

    BL = B * L
    BLp = pl.cdiv(BL, 8) * 8                       # pad packed rows to a sublane multiple
    h_flat = h.reshape(BL, D)
    if BLp > BL:
        h_flat = jnp.concatenate([h_flat, jnp.zeros((BLp - BL, D), jnp.float32)], axis=0)

    # additive attention mask: block-diagonal over batch, causal within a sequence, plus
    # open_clip build_cls_mask additions (literal F.pad(..., (1,0,Lm,0)) reproduction) on
    # each sequence's CLS (last) query row.  Pad rows/cols are fully masked.
    valid = (input_ids != pad_id)
    cls_add = jnp.concatenate([jnp.zeros((B, 1), jnp.float32),
                               jnp.where(valid, 0.0, NEG_INF)], axis=1)    # (B, L)
    idx = jnp.arange(BLp)
    b_of, p_of = idx // L, idx % L
    in_rng = idx < BL
    same_b = (b_of[:, None] == b_of[None, :]) & in_rng[:, None] & in_rng[None, :]
    causal = p_of[None, :] <= p_of[:, None]
    base = jnp.where(same_b & causal, 0.0, NEG_INF).astype(jnp.float32)
    cls_flat = jnp.concatenate([cls_add.reshape(-1),
                                jnp.zeros((BLp - BL,), jnp.float32)])
    is_cls_q = (p_of == (L - 1)) & in_rng
    mask = base + jnp.where(is_cls_q[:, None], cls_flat[None, :], 0.0)     # (BLp, BLp)
    # TODO(synk): at large B, skip the cross-batch score blocks entirely (per-sequence
    # attention or a batch grid axis) instead of masking them.

    pk = _pack_params(params)
    lnf_g = params['ln_final_g'].reshape(1, D)
    lnf_b = params['ln_final_b'].reshape(1, D)
    proj = params['text_projection'].astype(MATMUL_DTYPE)

    args = (h_flat, mask,
            pk['ln1_g'], pk['ln1_b'], pk['w_qkv'], pk['b_qkv'], pk['w_o'], pk['b_o'],
            pk['ln2_g'], pk['ln2_b'], pk['w_fc1'], pk['b_fc1'], pk['w_fc2'], pk['b_fc2'],
            lnf_g, lnf_b, proj)

    def const2(s0, s1):            # fetched once (constant block index), stays resident
        return pl.BlockSpec((s0, s1), lambda l: (0, 0))

    def per_layer(s1, s2):         # streamed per layer, double-buffered by Pallas
        return pl.BlockSpec((None, s1, s2), lambda l: (l, 0, 0))

    in_specs = [
        const2(BLp, D),              # h0
        const2(BLp, BLp),            # mask
        per_layer(1, D),             # ln1_g
        per_layer(1, D),             # ln1_b
        per_layer(D, 3 * D),         # w_qkv
        per_layer(1, 3 * D),         # b_qkv
        per_layer(D, D),             # w_o
        per_layer(1, D),             # b_o
        per_layer(1, D),             # ln2_g
        per_layer(1, D),             # ln2_b
        per_layer(D, Fh),            # w_fc1
        per_layer(1, Fh),            # b_fc1
        per_layer(Fh, D),            # w_fc2
        per_layer(1, D),             # b_fc2
        const2(1, D),                # ln_final_g
        const2(1, D),                # ln_final_b
        const2(D, P),                # text_projection (bf16)
    ]
    out_specs = (
        pl.BlockSpec((B, P), lambda l: (0, 0)),             # pooled projection (written last layer)
        pl.BlockSpec((None, B, D), lambda l: (l, 0, 0)),    # per-layer CLS features
    )
    out_shape = (jax.ShapeDtypeStruct((B, P), jnp.float32),
                 jax.ShapeDtypeStruct((NL, B, D), jnp.float32))

    flops = int(2 * NL * BLp * D * 3 * D             # fused QKV
                + 2 * NL * H * BLp * BLp * Hd * 2    # scores + context
                + 2 * NL * BLp * D * D               # output projection
                + 2 * NL * BLp * D * Fh * 2          # MLP
                + 2 * B * D * P)                     # epilogue
    transcendentals = int(NL * (H * BLp * BLp + BLp * Fh))
    bytes_accessed = int(sum(a.size * a.dtype.itemsize for a in args)
                         + B * P * 4 + NL * B * D * 4)

    kernel = functools.partial(_layer_kernel, num_layers=NL, num_heads=H,
                               batch=B, seq_len=L)

    # TODO(synk): add a 'parallel' grid axis (head-group or batch split) to occupy both
    # v7x TensorCores; the layer axis must stay 'arbitrary' (sequential residual carry).
    out, feats = pl.pallas_call(
        kernel,
        grid=(NL,),
        in_specs=in_specs,
        out_specs=out_specs,
        out_shape=out_shape,
        scratch_shapes=[pltpu.VMEM((BLp, D), jnp.float32)],   # persistent residual stream
        compiler_params=pltpu.CompilerParams(
            dimension_semantics=("arbitrary",),
            vmem_limit_bytes=64 * 1024 * 1024),
        cost_estimate=pl.CostEstimate(flops=flops,
                                      transcendentals=transcendentals,
                                      bytes_accessed=bytes_accessed),
    )(*args)

    return out, feats                                    # feats: (num_layers, B, D)


# ------------------------------ deterministic params ------------------------------

def init_params(key, *, vocab=64, D=32, num_layers=2, mlp_ratio=4, proj_dim=16, num_pos=9):
    keys = jax.random.split(key, 8 + num_layers)

    def nrm(k, shape, scale=0.02):
        return scale * jax.random.normal(k, shape, jnp.float32)

    params = {
        'token_embedding': nrm(keys[0], (vocab, D)),
        'positional_embedding': nrm(keys[1], (num_pos, D)),
        'cls_emb': nrm(keys[2], (D,)),
        'ln_final_g': jnp.ones((1, D), jnp.float32),
        'ln_final_b': jnp.zeros((1, D), jnp.float32),
        'text_projection': nrm(keys[3], (D, proj_dim)),
        'layers': [],
    }
    F_hidden = mlp_ratio * D
    for li in range(num_layers):
        lk = jax.random.split(keys[8 + li], 4)
        params['layers'].append({
            'ln1_g': jnp.ones((1, D), jnp.float32),
            'ln1_b': jnp.zeros((1, D), jnp.float32),
            'w_qkv': nrm(lk[0], (D, 3 * D)),
            'b_qkv': jnp.zeros((1, 3 * D), jnp.float32),
            'w_o': nrm(lk[1], (D, D)),
            'b_o': jnp.zeros((1, D), jnp.float32),
            'ln2_g': jnp.ones((1, D), jnp.float32),
            'ln2_b': jnp.zeros((1, D), jnp.float32),
            'w_fc1': nrm(lk[2], (D, F_hidden)),
            'b_fc1': jnp.zeros((1, F_hidden), jnp.float32),
            'w_fc2': nrm(lk[3], (F_hidden, D)),
            'b_fc2': jnp.zeros((1, D), jnp.float32),
        })
    return params


if __name__ == "__main__":
    key = jax.random.PRNGKey(0)
    k_param, k_ids = jax.random.split(key)

    B, ctx = 2, 9            # raw ids length 9 -> drop last (8) -> +CLS -> seq_len 9
    vocab, D, layers, heads, proj_dim = 64, 32, 2, 4, 16

    params = init_params(k_param, vocab=vocab, D=D, num_layers=layers,
                         proj_dim=proj_dim, num_pos=ctx)

    input_ids = jax.random.randint(k_ids, (B, ctx), 1, vocab, dtype=jnp.int32)
    input_ids = input_ids.at[1, 6].set(0)   # one pad token to exercise build_cls_mask

    out, txt_feats = text_encoder_zs_forward(input_ids, params, embed_cls=True,
                                             pad_id=0, num_heads=heads)
    jax.block_until_ready((out, txt_feats))

    assert out.shape == (B, proj_dim)
    assert txt_feats.shape == (layers, B, D)
    assert bool(jnp.all(jnp.isfinite(out))) and bool(jnp.all(jnp.isfinite(txt_feats)))
    print("KERNEL_OK")
</pallas_src>

<mosaic_0001>
module attributes {stable_mosaic.version = 11 : i64} {
  func.func @_layer_kernel(%arg0: i32, %arg1: memref<24x32xf32, #tpu.memory_space<vmem>>, %arg2: memref<24x24xf32, #tpu.memory_space<vmem>>, %arg3: memref<1x1x32xf32, #tpu.memory_space<vmem>>, %arg4: memref<1x1x32xf32, #tpu.memory_space<vmem>>, %arg5: memref<1x32x96xbf16, #tpu.memory_space<vmem>>, %arg6: memref<1x1x96xf32, #tpu.memory_space<vmem>>, %arg7: memref<1x32x32xbf16, #tpu.memory_space<vmem>>, %arg8: memref<1x1x32xf32, #tpu.memory_space<vmem>>, %arg9: memref<1x1x32xf32, #tpu.memory_space<vmem>>, %arg10: memref<1x1x32xf32, #tpu.memory_space<vmem>>, %arg11: memref<1x32x128xbf16, #tpu.memory_space<vmem>>, %arg12: memref<1x1x128xf32, #tpu.memory_space<vmem>>, %arg13: memref<1x128x32xbf16, #tpu.memory_space<vmem>>, %arg14: memref<1x1x32xf32, #tpu.memory_space<vmem>>, %arg15: memref<1x32xf32, #tpu.memory_space<vmem>>, %arg16: memref<1x32xf32, #tpu.memory_space<vmem>>, %arg17: memref<32x16xbf16, #tpu.memory_space<vmem>>, %arg18: memref<2x16xf32, #tpu.memory_space<vmem>>, %arg19: memref<1x2x32xf32, #tpu.memory_space<vmem>>, %arg20: memref<24x32xf32, #tpu.memory_space<vmem>>) attributes {dimension_semantics = [#tpu.dimension_semantics<arbitrary>], iteration_bounds = array<i64: 2>, scalar_prefetch = 0 : i64, scratch_operands = 1 : i64, tpu.core_type = #tpu.core_type<tc>, window_params = [{pipeline_mode = #tpu.pipeline_mode<synchronous>, transform_indices = @transform_0, window_bounds = array<i64: 24, 32>}, {pipeline_mode = #tpu.pipeline_mode<synchronous>, transform_indices = @transform_1, window_bounds = array<i64: 24, 24>}, {transform_indices = @transform_2, window_bounds = array<i64: 1, 1, 32>}, {transform_indices = @transform_3, window_bounds = array<i64: 1, 1, 32>}, {transform_indices = @transform_4, window_bounds = array<i64: 1, 32, 96>}, {transform_indices = @transform_5, window_bounds = array<i64: 1, 1, 96>}, {transform_indices = @transform_6, window_bounds = array<i64: 1, 32, 32>}, {transform_indices = @transform_7, window_bounds = array<i64: 1, 1, 32>}, {transform_indices = @transform_8, window_bounds = array<i64: 1, 1, 32>}, {transform_indices = @transform_9, window_bounds = array<i64: 1, 1, 32>}, {transform_indices = @transform_10, window_bounds = array<i64: 1, 32, 128>}, {transform_indices = @transform_11, window_bounds = array<i64: 1, 1, 128>}, {transform_indices = @transform_12, window_bounds = array<i64: 1, 128, 32>}, {transform_indices = @transform_13, window_bounds = array<i64: 1, 1, 32>}, {pipeline_mode = #tpu.pipeline_mode<synchronous>, transform_indices = @transform_14, window_bounds = array<i64: 1, 32>}, {pipeline_mode = #tpu.pipeline_mode<synchronous>, transform_indices = @transform_15, window_bounds = array<i64: 1, 32>}, {pipeline_mode = #tpu.pipeline_mode<synchronous>, transform_indices = @transform_16, window_bounds = array<i64: 32, 16>}, {pipeline_mode = #tpu.pipeline_mode<synchronous>, transform_indices = @transform_17, window_bounds = array<i64: 2, 16>}, {transform_indices = @transform_18, window_bounds = array<i64: 1, 2, 32>}]} {
    %c0_i32 = arith.constant 0 : i32
    %0 = arith.cmpi eq, %arg0, %c0_i32 : i32
    %1 = arith.extui %0 : i1 to i32
    %c0_i32_0 = arith.constant 0 : i32
    %2 = arith.cmpi ne, %1, %c0_i32_0 : i32
    scf.if %2 {
      %c0_83 = arith.constant 0 : index
      %c0_84 = arith.constant 0 : index
      %203 = vector.load %arg1[%c0_83, %c0_84] : memref<24x32xf32, #tpu.memory_space<vmem>>, vector<24x32xf32>
      %c0_85 = arith.constant 0 : index
      %c0_86 = arith.constant 0 : index
      %204 = vector.load %arg20[%c0_85, %c0_86] : memref<24x32xf32, #tpu.memory_space<vmem>>, vector<24x32xf32>
      tpu.vector_store %arg20[%c0_85, %c0_86], %203 {strides = array<i32>} : memref<24x32xf32, #tpu.memory_space<vmem>>, vector<24x32xf32>,
    } else {
    }
    %c0 = arith.constant 0 : index
    %c0_1 = arith.constant 0 : index
    %3 = vector.load %arg20[%c0, %c0_1] : memref<24x32xf32, #tpu.memory_space<vmem>>, vector<24x32xf32>
    %c0_2 = arith.constant 0 : index
    %c0_3 = arith.constant 0 : index
    %4 = vector.load %arg2[%c0_2, %c0_3] : memref<24x24xf32, #tpu.memory_space<vmem>>, vector<24x24xf32>
    %c0_4 = arith.constant 0 : index
    %c0_5 = arith.constant 0 : index
    %c0_6 = arith.constant 0 : index
    %5 = vector.load %arg3[%c0_4, %c0_5, %c0_6] : memref<1x1x32xf32, #tpu.memory_space<vmem>>, vector<1x1x32xf32>
    %6 = vector.shape_cast %5 : vector<1x1x32xf32> to vector<1x32xf32>
    %c0_7 = arith.constant 0 : index
    %c0_8 = arith.constant 0 : index
    %c0_9 = arith.constant 0 : index
    %7 = vector.load %arg4[%c0_7, %c0_8, %c0_9] : memref<1x1x32xf32, #tpu.memory_space<vmem>>, vector<1x1x32xf32>
    %8 = vector.shape_cast %7 : vector<1x1x32xf32> to vector<1x32xf32>
    %cst = arith.constant dense<0.000000e+00> : vector<24xf32>
    %9 = vector.multi_reduction <add>, %3, %cst [1] : vector<24x32xf32> to vector<24xf32>
    %10 = vector.shape_cast %9 : vector<24xf32> to vector<24x1xf32>
    %cst_10 = arith.constant 3.200000e+01 : f32
    %11 = vector.broadcast %cst_10 : f32 to vector<24x1xf32>
    %12 = arith.divf %10, %11 : vector<24x1xf32>
    %13 = vector.broadcast %12 : vector<24x1xf32> to vector<24x32xf32>
    %14 = arith.subf %3, %13 : vector<24x32xf32>
    %15 = arith.mulf %14, %14 : vector<24x32xf32>
    %cst_11 = arith.constant dense<0.000000e+00> : vector<24xf32>
    %16 = vector.multi_reduction <add>, %15, %cst_11 [1] : vector<24x32xf32> to vector<24xf32>
    %17 = vector.shape_cast %16 : vector<24xf32> to vector<24x1xf32>
    %cst_12 = arith.constant 3.200000e+01 : f32
    %18 = vector.broadcast %cst_12 : f32 to vector<24x1xf32>
    %19 = arith.divf %17, %18 : vector<24x1xf32>
    %20 = vector.broadcast %12 : vector<24x1xf32> to vector<24x32xf32>
    %21 = arith.subf %3, %20 : vector<24x32xf32>
    %cst_13 = arith.constant 9.99999974E-6 : f32
    %22 = vector.broadcast %cst_13 : f32 to vector<24x1xf32>
    %23 = arith.addf %19, %22 : vector<24x1xf32>
    %24 = math.rsqrt %23 : vector<24x1xf32>
    %25 = vector.broadcast %24 : vector<24x1xf32> to vector<24x32xf32>
    %26 = arith.mulf %21, %25 : vector<24x32xf32>
    %27 = vector.broadcast %6 : vector<1x32xf32> to vector<24x32xf32>
    %28 = arith.mulf %26, %27 : vector<24x32xf32>
    %29 = vector.broadcast %8 : vector<1x32xf32> to vector<24x32xf32>
    %30 = arith.addf %28, %29 : vector<24x32xf32>
    %31 = arith.truncf %30 : vector<24x32xf32> to vector<24x32xbf16>
    %c0_14 = arith.constant 0 : index
    %c0_15 = arith.constant 0 : index
    %c0_16 = arith.constant 0 : index
    %32 = vector.load %arg5[%c0_14, %c0_15, %c0_16] : memref<1x32x96xbf16, #tpu.memory_space<vmem>>, vector<1x32x96xbf16>
    %33 = vector.shape_cast %32 : vector<1x32x96xbf16> to vector<32x96xbf16>
    %cst_17 = arith.constant dense<0.000000e+00> : vector<24x96xf32>
    %34 = tpu.matmul %31, %33, %cst_17 {dimension_numbers = #tpu.dot_dimension_numbers<[1], [0], [0], [1], [0, 0, 1, 1], [], []>} : vector<24x32xbf16>, vector<32x96xbf16>, vector<24x96xf32> -> vector<24x96xf32>
    %c0_18 = arith.constant 0 : index
    %c0_19 = arith.constant 0 : index
    %c0_20 = arith.constant 0 : index
    %35 = vector.load %arg6[%c0_18, %c0_19, %c0_20] : memref<1x1x96xf32, #tpu.memory_space<vmem>>, vector<1x1x96xf32>
    %36 = vector.shape_cast %35 : vector<1x1x96xf32> to vector<1x96xf32>
    %37 = vector.broadcast %36 : vector<1x96xf32> to vector<24x96xf32>
    %38 = arith.addf %34, %37 : vector<24x96xf32>
    %39 = vector.extract_strided_slice %38 {offsets = [0, 0], sizes = [24, 8], strides = [1, 1]} : vector<24x96xf32> to vector<24x8xf32>
    %40 = arith.truncf %39 : vector<24x8xf32> to vector<24x8xbf16>
    %41 = vector.extract_strided_slice %38 {offsets = [0, 32], sizes = [24, 8], strides = [1, 1]} : vector<24x96xf32> to vector<24x8xf32>
    %42 = arith.truncf %41 : vector<24x8xf32> to vector<24x8xbf16>
    %43 = vector.extract_strided_slice %38 {offsets = [0, 64], sizes = [24, 8], strides = [1, 1]} : vector<24x96xf32> to vector<24x8xf32>
    %44 = arith.truncf %43 : vector<24x8xf32> to vector<24x8xbf16>
    %cst_21 = arith.constant dense<0.000000e+00> : vector<24x24xf32>
    %45 = tpu.matmul %40, %42, %cst_21 {dimension_numbers = #tpu.dot_dimension_numbers<[1], [1], [0], [0], [0, 0, 1, 0], [], []>} : vector<24x8xbf16>, vector<24x8xbf16>, vector<24x24xf32> -> vector<24x24xf32>
    %cst_22 = arith.constant 0.353553385 : f32
    %46 = vector.broadcast %cst_22 : f32 to vector<24x24xf32>
    %47 = arith.mulf %45, %46 : vector<24x24xf32>
    %48 = arith.addf %47, %4 : vector<24x24xf32>
    %cst_23 = arith.constant dense<0xFF800000> : vector<24xf32>
    %49 = vector.multi_reduction <maximumf>, %48, %cst_23 [1] : vector<24x24xf32> to vector<24xf32>
    %50 = vector.shape_cast %49 : vector<24xf32> to vector<24x1xf32>
    %51 = vector.broadcast %50 : vector<24x1xf32> to vector<24x24xf32>
    %52 = arith.subf %48, %51 : vector<24x24xf32>
    %53 = math.exp %52 : vector<24x24xf32>
    %cst_24 = arith.constant dense<0.000000e+00> : vector<24xf32>
    %54 = vector.multi_reduction <add>, %53, %cst_24 [1] : vector<24x24xf32> to vector<24xf32>
    %55 = vector.shape_cast %54 : vector<24xf32> to vector<24x1xf32>
    %56 = tpu.reciprocal %55 {approx = true} : vector<24x1xf32> -> vector<24x1xf32>
    %57 = vector.broadcast %56 : vector<24x1xf32> to vector<24x24xf32>
    %58 = arith.mulf %53, %57 : vector<24x24xf32>
    %59 = arith.truncf %58 : vector<24x24xf32> to vector<24x24xbf16>
    %cst_25 = arith.constant dense<0.000000e+00> : vector<24x8xf32>
    %60 = tpu.matmul %59, %44, %cst_25 {dimension_numbers = #tpu.dot_dimension_numbers<[1], [0], [0], [1], [0, 0, 1, 1], [], []>} : vector<24x24xbf16>, vector<24x8xbf16>, vector<24x8xf32> -> vector<24x8xf32>
    %61 = vector.extract_strided_slice %38 {offsets = [0, 8], sizes = [24, 8], strides = [1, 1]} : vector<24x96xf32> to vector<24x8xf32>
    %62 = arith.truncf %61 : vector<24x8xf32> to vector<24x8xbf16>
    %63 = vector.extract_strided_slice %38 {offsets = [0, 40], sizes = [24, 8], strides = [1, 1]} : vector<24x96xf32> to vector<24x8xf32>
    %64 = arith.truncf %63 : vector<24x8xf32> to vector<24x8xbf16>
    %65 = vector.extract_strided_slice %38 {offsets = [0, 72], sizes = [24, 8], strides = [1, 1]} : vector<24x96xf32> to vector<24x8xf32>
    %66 = arith.truncf %65 : vector<24x8xf32> to vector<24x8xbf16>
    %cst_26 = arith.constant dense<0.000000e+00> : vector<24x24xf32>
    %67 = tpu.matmul %62, %64, %cst_26 {dimension_numbers = #tpu.dot_dimension_numbers<[1], [1], [0], [0], [0, 0, 1, 0], [], []>} : vector<24x8xbf16>, vector<24x8xbf16>, vector<24x24xf32> -> vector<24x24xf32>
    %cst_27 = arith.constant 0.353553385 : f32
    %68 = vector.broadcast %cst_27 : f32 to vector<24x24xf32>
    %69 = arith.mulf %67, %68 : vector<24x24xf32>
    %70 = arith.addf %69, %4 : vector<24x24xf32>
    %cst_28 = arith.constant dense<0xFF800000> : vector<24xf32>
    %71 = vector.multi_reduction <maximumf>, %70, %cst_28 [1] : vector<24x24xf32> to vector<24xf32>
    %72 = vector.shape_cast %71 : vector<24xf32> to vector<24x1xf32>
    %73 = vector.broadcast %72 : vector<24x1xf32> to vector<24x24xf32>
    %74 = arith.subf %70, %73 : vector<24x24xf32>
    %75 = math.exp %74 : vector<24x24xf32>
    %cst_29 = arith.constant dense<0.000000e+00> : vector<24xf32>
    %76 = vector.multi_reduction <add>, %75, %cst_29 [1] : vector<24x24xf32> to vector<24xf32>
    %77 = vector.shape_cast %76 : vector<24xf32> to vector<24x1xf32>
    %78 = tpu.reciprocal %77 {approx = true} : vector<24x1xf32> -> vector<24x1xf32>
    %79 = vector.broadcast %78 : vector<24x1xf32> to vector<24x24xf32>
    %80 = arith.mulf %75, %79 : vector<24x24xf32>
    %81 = arith.truncf %80 : vector<24x24xf32> to vector<24x24xbf16>
    %cst_30 = arith.constant dense<0.000000e+00> : vector<24x8xf32>
    %82 = tpu.matmul %81, %66, %cst_30 {dimension_numbers = #tpu.dot_dimension_numbers<[1], [0], [0], [1], [0, 0, 1, 1], [], []>} : vector<24x24xbf16>, vector<24x8xbf16>, vector<24x8xf32> -> vector<24x8xf32>
    %83 = vector.extract_strided_slice %38 {offsets = [0, 16], sizes = [24, 8], strides = [1, 1]} : vector<24x96xf32> to vector<24x8xf32>
    %84 = arith.truncf %83 : vector<24x8xf32> to vector<24x8xbf16>
    %85 = vector.extract_strided_slice %38 {offsets = [0, 48], sizes = [24, 8], strides = [1, 1]} : vector<24x96xf32> to vector<24x8xf32>
    %86 = arith.truncf %85 : vector<24x8xf32> to vector<24x8xbf16>
    %87 = vector.extract_strided_slice %38 {offsets = [0, 80], sizes = [24, 8], strides = [1, 1]} : vector<24x96xf32> to vector<24x8xf32>
    %88 = arith.truncf %87 : vector<24x8xf32> to vector<24x8xbf16>
    %cst_31 = arith.constant dense<0.000000e+00> : vector<24x24xf32>
    %89 = tpu.matmul %84, %86, %cst_31 {dimension_numbers = #tpu.dot_dimension_numbers<[1], [1], [0], [0], [0, 0, 1, 0], [], []>} : vector<24x8xbf16>, vector<24x8xbf16>, vector<24x24xf32> -> vector<24x24xf32>
    %cst_32 = arith.constant 0.353553385 : f32
    %90 = vector.broadcast %cst_32 : f32 to vector<24x24xf32>
    %91 = arith.mulf %89, %90 : vector<24x24xf32>
    %92 = arith.addf %91, %4 : vector<24x24xf32>
    %cst_33 = arith.constant dense<0xFF800000> : vector<24xf32>
    %93 = vector.multi_reduction <maximumf>, %92, %cst_33 [1] : vector<24x24xf32> to vector<24xf32>
    %94 = vector.shape_cast %93 : vector<24xf32> to vector<24x1xf32>
    %95 = vector.broadcast %94 : vector<24x1xf32> to vector<24x24xf32>
    %96 = arith.subf %92, %95 : vector<24x24xf32>
    %97 = math.exp %96 : vector<24x24xf32>
    %cst_34 = arith.constant dense<0.000000e+00> : vector<24xf32>
    %98 = vector.multi_reduction <add>, %97, %cst_34 [1] : vector<24x24xf32> to vector<24xf32>
    %99 = vector.shape_cast %98 : vector<24xf32> to vector<24x1xf32>
    %100 = tpu.reciprocal %99 {approx = true} : vector<24x1xf32> -> vector<24x1xf32>
    %101 = vector.broadcast %100 : vector<24x1xf32> to vector<24x24xf32>
    %102 = arith.mulf %97, %101 : vector<24x24xf32>
    %103 = arith.truncf %102 : vector<24x24xf32> to vector<24x24xbf16>
    %cst_35 = arith.constant dense<0.000000e+00> : vector<24x8xf32>
    %104 = tpu.matmul %103, %88, %cst_35 {dimension_numbers = #tpu.dot_dimension_numbers<[1], [0], [0], [1], [0, 0, 1, 1], [], []>} : vector<24x24xbf16>, vector<24x8xbf16>, vector<24x8xf32> -> vector<24x8xf32>
    %105 = vector.extract_strided_slice %38 {offsets = [0, 24], sizes = [24, 8], strides = [1, 1]} : vector<24x96xf32> to vector<24x8xf32>
    %106 = arith.truncf %105 : vector<24x8xf32> to vector<24x8xbf16>
    %107 = vector.extract_strided_slice %38 {offsets = [0, 56], sizes = [24, 8], strides = [1, 1]} : vector<24x96xf32> to vector<24x8xf32>
    %108 = arith.truncf %107 : vector<24x8xf32> to vector<24x8xbf16>
    %109 = vector.extract_strided_slice %38 {offsets = [0, 88], sizes = [24, 8], strides = [1, 1]} : vector<24x96xf32> to vector<24x8xf32>
    %110 = arith.truncf %109 : vector<24x8xf32> to vector<24x8xbf16>
    %cst_36 = arith.constant dense<0.000000e+00> : vector<24x24xf32>
    %111 = tpu.matmul %106, %108, %cst_36 {dimension_numbers = #tpu.dot_dimension_numbers<[1], [1], [0], [0], [0, 0, 1, 0], [], []>} : vector<24x8xbf16>, vector<24x8xbf16>, vector<24x24xf32> -> vector<24x24xf32>
    %cst_37 = arith.constant 0.353553385 : f32
    %112 = vector.broadcast %cst_37 : f32 to vector<24x24xf32>
    %113 = arith.mulf %111, %112 : vector<24x24xf32>
    %114 = arith.addf %113, %4 : vector<24x24xf32>
    %cst_38 = arith.constant dense<0xFF800000> : vector<24xf32>
    %115 = vector.multi_reduction <maximumf>, %114, %cst_38 [1] : vector<24x24xf32> to vector<24xf32>
    %116 = vector.shape_cast %115 : vector<24xf32> to vector<24x1xf32>
    %117 = vector.broadcast %116 : vector<24x1xf32> to vector<24x24xf32>
    %118 = arith.subf %114, %117 : vector<24x24xf32>
    %119 = math.exp %118 : vector<24x24xf32>
    %cst_39 = arith.constant dense<0.000000e+00> : vector<24xf32>
    %120 = vector.multi_reduction <add>, %119, %cst_39 [1] : vector<24x24xf32> to vector<24xf32>
    %121 = vector.shape_cast %120 : vector<24xf32> to vector<24x1xf32>
    %122 = tpu.reciprocal %121 {approx = true} : vector<24x1xf32> -> vector<24x1xf32>
    %123 = vector.broadcast %122 : vector<24x1xf32> to vector<24x24xf32>
    %124 = arith.mulf %119, %123 : vector<24x24xf32>
    %125 = arith.truncf %124 : vector<24x24xf32> to vector<24x24xbf16>
    %cst_40 = arith.constant dense<0.000000e+00> : vector<24x8xf32>
    %126 = tpu.matmul %125, %110, %cst_40 {dimension_numbers = #tpu.dot_dimension_numbers<[1], [0], [0], [1], [0, 0, 1, 1], [], []>} : vector<24x24xbf16>, vector<24x8xbf16>, vector<24x8xf32> -> vector<24x8xf32>
    %127 = tpu.concatenate %60, %82, %104, %126 in 1 : vector<24x8xf32>, vector<24x8xf32>, vector<24x8xf32>, vector<24x8xf32> -> vector<24x32xf32>
    %128 = arith.truncf %127 : vector<24x32xf32> to vector<24x32xbf16>
    %c0_41 = arith.constant 0 : index
    %c0_42 = arith.constant 0 : index
    %c0_43 = arith.constant 0 : index
    %129 = vector.load %arg7[%c0_41, %c0_42, %c0_43] : memref<1x32x32xbf16, #tpu.memory_space<vmem>>, vector<1x32x32xbf16>
    %130 = vector.shape_cast %129 : vector<1x32x32xbf16> to vector<32x32xbf16>
    %cst_44 = arith.constant dense<0.000000e+00> : vector<24x32xf32>
    %131 = tpu.matmul %128, %130, %cst_44 {dimension_numbers = #tpu.dot_dimension_numbers<[1], [0], [0], [1], [0, 0, 1, 1], [], []>} : vector<24x32xbf16>, vector<32x32xbf16>, vector<24x32xf32> -> vector<24x32xf32>
    %c0_45 = arith.constant 0 : index
    %c0_46 = arith.constant 0 : index
    %c0_47 = arith.constant 0 : index
    %132 = vector.load %arg8[%c0_45, %c0_46, %c0_47] : memref<1x1x32xf32, #tpu.memory_space<vmem>>, vector<1x1x32xf32>
    %133 = vector.shape_cast %132 : vector<1x1x32xf32> to vector<1x32xf32>
    %134 = vector.broadcast %133 : vector<1x32xf32> to vector<24x32xf32>
    %135 = arith.addf %131, %134 : vector<24x32xf32>
    %136 = arith.addf %3, %135 : vector<24x32xf32>
    %c0_48 = arith.constant 0 : index
    %c0_49 = arith.constant 0 : index
    %c0_50 = arith.constant 0 : index
    %137 = vector.load %arg9[%c0_48, %c0_49, %c0_50] : memref<1x1x32xf32, #tpu.memory_space<vmem>>, vector<1x1x32xf32>
    %138 = vector.shape_cast %137 : vector<1x1x32xf32> to vector<1x32xf32>
    %c0_51 = arith.constant 0 : index
    %c0_52 = arith.constant 0 : index
    %c0_53 = arith.constant 0 : index
    %139 = vector.load %arg10[%c0_51, %c0_52, %c0_53] : memref<1x1x32xf32, #tpu.memory_space<vmem>>, vector<1x1x32xf32>
    %140 = vector.shape_cast %139 : vector<1x1x32xf32> to vector<1x32xf32>
    %cst_54 = arith.constant dense<0.000000e+00> : vector<24xf32>
    %141 = vector.multi_reduction <add>, %136, %cst_54 [1] : vector<24x32xf32> to vector<24xf32>
    %142 = vector.shape_cast %141 : vector<24xf32> to vector<24x1xf32>
    %cst_55 = arith.constant 3.200000e+01 : f32
    %143 = vector.broadcast %cst_55 : f32 to vector<24x1xf32>
    %144 = arith.divf %142, %143 : vector<24x1xf32>
    %145 = vector.broadcast %144 : vector<24x1xf32> to vector<24x32xf32>
    %146 = arith.subf %136, %145 : vector<24x32xf32>
    %147 = arith.mulf %146, %146 : vector<24x32xf32>
    %cst_56 = arith.constant dense<0.000000e+00> : vector<24xf32>
    %148 = vector.multi_reduction <add>, %147, %cst_56 [1] : vector<24x32xf32> to vector<24xf32>
    %149 = vector.shape_cast %148 : vector<24xf32> to vector<24x1xf32>
    %cst_57 = arith.constant 3.200000e+01 : f32
    %150 = vector.broadcast %cst_57 : f32 to vector<24x1xf32>
    %151 = arith.divf %149, %150 : vector<24x1xf32>
    %152 = vector.broadcast %144 : vector<24x1xf32> to vector<24x32xf32>
    %153 = arith.subf %136, %152 : vector<24x32xf32>
    %cst_58 = arith.constant 9.99999974E-6 : f32
    %154 = vector.broadcast %cst_58 : f32 to vector<24x1xf32>
    %155 = arith.addf %151, %154 : vector<24x1xf32>
    %156 = math.rsqrt %155 : vector<24x1xf32>
    %157 = vector.broadcast %156 : vector<24x1xf32> to vector<24x32xf32>
    %158 = arith.mulf %153, %157 : vector<24x32xf32>
    %159 = vector.broadcast %138 : vector<1x32xf32> to vector<24x32xf32>
    %160 = arith.mulf %158, %159 : vector<24x32xf32>
    %161 = vector.broadcast %140 : vector<1x32xf32> to vector<24x32xf32>
    %162 = arith.addf %160, %161 : vector<24x32xf32>
    %163 = arith.truncf %162 : vector<24x32xf32> to vector<24x32xbf16>
    %c0_59 = arith.constant 0 : index
    %c0_60 = arith.constant 0 : index
    %c0_61 = arith.constant 0 : index
    %164 = vector.load %arg11[%c0_59, %c0_60, %c0_61] : memref<1x32x128xbf16, #tpu.memory_space<vmem>>, vector<1x32x128xbf16>
    %165 = vector.shape_cast %164 : vector<1x32x128xbf16> to vector<32x128xbf16>
    %cst_62 = arith.constant dense<0.000000e+00> : vector<24x128xf32>
    %166 = tpu.matmul %163, %165, %cst_62 {dimension_numbers = #tpu.dot_dimension_numbers<[1], [0], [0], [1], [0, 0, 1, 1], [], []>} : vector<24x32xbf16>, vector<32x128xbf16>, vector<24x128xf32> -> vector<24x128xf32>
    %c0_63 = arith.constant 0 : index
    %c0_64 = arith.constant 0 : index
    %c0_65 = arith.constant 0 : index
    %167 = vector.load %arg12[%c0_63, %c0_64, %c0_65] : memref<1x1x128xf32, #tpu.memory_space<vmem>>, vector<1x1x128xf32>
    %168 = vector.shape_cast %167 : vector<1x1x128xf32> to vector<1x128xf32>
    %169 = vector.broadcast %168 : vector<1x128xf32> to vector<24x128xf32>
    %170 = arith.addf %166, %169 : vector<24x128xf32>
    %cst_66 = arith.constant 5.000000e-01 : f32
    %171 = vector.broadcast %cst_66 : f32 to vector<24x128xf32>
    %172 = arith.mulf %171, %170 : vector<24x128xf32>
    %cst_67 = arith.constant 4.471500e-02 : f32
    %173 = vector.broadcast %cst_67 : f32 to vector<24x128xf32>
    %174 = arith.mulf %173, %170 : vector<24x128xf32>
    %175 = arith.mulf %174, %170 : vector<24x128xf32>
    %176 = arith.mulf %175, %170 : vector<24x128xf32>
    %177 = arith.addf %170, %176 : vector<24x128xf32>
    %cst_68 = arith.constant 0.797884583 : f32
    %178 = vector.broadcast %cst_68 : f32 to vector<24x128xf32>
    %179 = arith.mulf %178, %177 : vector<24x128xf32>
    %180 = math.tanh %179 : vector<24x128xf32>
    %cst_69 = arith.constant 1.000000e+00 : f32
    %181 = vector.broadcast %cst_69 : f32 to vector<24x128xf32>
    %182 = arith.addf %181, %180 : vector<24x128xf32>
    %183 = arith.mulf %172, %182 : vector<24x128xf32>
    %184 = arith.truncf %183 : vector<24x128xf32> to vector<24x128xbf16>
    %c0_70 = arith.constant 0 : index
    %c0_71 = arith.constant 0 : index
    %c0_72 = arith.constant 0 : index
    %185 = vector.load %arg13[%c0_70, %c0_71, %c0_72] : memref<1x128x32xbf16, #tpu.memory_space<vmem>>, vector<1x128x32xbf16>
    %186 = vector.shape_cast %185 : vector<1x128x32xbf16> to vector<128x32xbf16>
    %cst_73 = arith.constant dense<0.000000e+00> : vector<24x32xf32>
    %187 = tpu.matmul %184, %186, %cst_73 {dimension_numbers = #tpu.dot_dimension_numbers<[1], [0], [0], [1], [0, 0, 1, 1], [], []>} : vector<24x128xbf16>, vector<128x32xbf16>, vector<24x32xf32> -> vector<24x32xf32>
    %c0_74 = arith.constant 0 : index
    %c0_75 = arith.constant 0 : index
    %c0_76 = arith.constant 0 : index
    %188 = vector.load %arg14[%c0_74, %c0_75, %c0_76] : memref<1x1x32xf32, #tpu.memory_space<vmem>>, vector<1x1x32xf32>
    %189 = vector.shape_cast %188 : vector<1x1x32xf32> to vector<1x32xf32>
    %190 = vector.broadcast %189 : vector<1x32xf32> to vector<24x32xf32>
    %191 = arith.addf %187, %190 : vector<24x32xf32>
    %192 = arith.addf %136, %191 : vector<24x32xf32>
    %c0_77 = arith.constant 0 : index
    %c0_78 = arith.constant 0 : index
    %193 = vector.load %arg20[%c0_77, %c0_78] : memref<24x32xf32, #tpu.memory_space<vmem>>, vector<24x32xf32>
    tpu.vector_store %arg20[%c0_77, %c0_78], %192 {strides = array<i32>} : memref<24x32xf32, #tpu.memory_space<vmem>>, vector<24x32xf32>,
    %194 = vector.extract_strided_slice %192 {offsets = [8, 0], sizes = [1, 32], strides = [1, 1]} : vector<24x32xf32> to vector<1x32xf32>
    %195 = vector.extract_strided_slice %192 {offsets = [17, 0], sizes = [1, 32], strides = [1, 1]} : vector<24x32xf32> to vector<1x32xf32>
    %196 = tpu.concatenate %194, %195 in 0 : vector<1x32xf32>, vector<1x32xf32> -> vector<2x32xf32>
    %c0_79 = arith.constant 0 : index
    %c0_80 = arith.constant 0 : index
    %c0_81 = arith.constant 0 : index
    %197 = vector.load %arg19[%c0_79, %c0_80, %c0_81] : memref<1x2x32xf32, #tpu.memory_space<vmem>>, vector<1x2x32xf32>
    %198 = vector.shape_cast %197 : vector<1x2x32xf32> to vector<2x32xf32>
    %199 = vector.shape_cast %196 : vector<2x32xf32> to vector<1x2x32xf32>
    tpu.vector_store %arg19[%c0_79, %c0_80, %c0_81], %199 {strides = array<i32>} : memref<1x2x32xf32, #tpu.memory_space<vmem>>, vector<1x2x32xf32>,
    %c1_i32 = arith.constant 1 : i32
    %200 = arith.cmpi eq, %arg0, %c1_i32 : i32
    %201 = arith.extui %200 : i1 to i32
    %c0_i32_82 = arith.constant 0 : i32
    %202 = arith.cmpi ne, %201, %c0_i32_82 : i32
    scf.if %202 {
      %c0_83 = arith.constant 0 : index
      %c0_84 = arith.constant 0 : index
      %203 = vector.load %arg15[%c0_83, %c0_84] : memref<1x32xf32, #tpu.memory_space<vmem>>, vector<1x32xf32>
      %c0_85 = arith.constant 0 : index
      %c0_86 = arith.constant 0 : index
      %204 = vector.load %arg16[%c0_85, %c0_86] : memref<1x32xf32, #tpu.memory_space<vmem>>, vector<1x32xf32>
      %cst_87 = arith.constant dense<0.000000e+00> : vector<2xf32>
      %205 = vector.multi_reduction <add>, %196, %cst_87 [1] : vector<2x32xf32> to vector<2xf32>
      %206 = vector.shape_cast %205 : vector<2xf32> to vector<2x1xf32>
      %cst_88 = arith.constant 3.200000e+01 : f32
      %207 = vector.broadcast %cst_88 : f32 to vector<2x1xf32>
      %208 = arith.divf %206, %207 : vector<2x1xf32>
      %209 = vector.broadcast %208 : vector<2x1xf32> to vector<2x32xf32>
      %210 = arith.subf %196, %209 : vector<2x32xf32>
      %211 = arith.mulf %210, %210 : vector<2x32xf32>
      %cst_89 = arith.constant dense<0.000000e+00> : vector<2xf32>
      %212 = vector.multi_reduction <add>, %211, %cst_89 [1] : vector<2x32xf32> to vector<2xf32>
      %213 = vector.shape_cast %212 : vector<2xf32> to vector<2x1xf32>
      %cst_90 = arith.constant 3.200000e+01 : f32
      %214 = vector.broadcast %cst_90 : f32 to vector<2x1xf32>
      %215 = arith.divf %213, %214 : vector<2x1xf32>
      %216 = vector.broadcast %208 : vector<2x1xf32> to vector<2x32xf32>
      %217 = arith.subf %196, %216 : vector<2x32xf32>
      %cst_91 = arith.constant 9.99999974E-6 : f32
      %218 = vector.broadcast %cst_91 : f32 to vector<2x1xf32>
      %219 = arith.addf %215, %218 : vector<2x1xf32>
      %220 = math.rsqrt %219 : vector<2x1xf32>
      %221 = vector.broadcast %220 : vector<2x1xf32> to vector<2x32xf32>
      %222 = arith.mulf %217, %221 : vector<2x32xf32>
      %223 = vector.broadcast %203 : vector<1x32xf32> to vector<2x32xf32>
      %224 = arith.mulf %222, %223 : vector<2x32xf32>
      %225 = vector.broadcast %204 : vector<1x32xf32> to vector<2x32xf32>
      %226 = arith.addf %224, %225 : vector<2x32xf32>
      %227 = arith.truncf %226 : vector<2x32xf32> to vector<2x32xbf16>
      %c0_92 = arith.constant 0 : index
      %c0_93 = arith.constant 0 : index
      %228 = vector.load %arg17[%c0_92, %c0_93] : memref<32x16xbf16, #tpu.memory_space<vmem>>, vector<32x16xbf16>
      %cst_94 = arith.constant dense<0.000000e+00> : vector<2x16xf32>
      %229 = tpu.matmul %227, %228, %cst_94 {dimension_numbers = #tpu.dot_dimension_numbers<[1], [0], [0], [1], [0, 0, 1, 1], [], []>} : vector<2x32xbf16>, vector<32x16xbf16>, vector<2x16xf32> -> vector<2x16xf32>
      %c0_95 = arith.constant 0 : index
      %c0_96 = arith.constant 0 : index
      %230 = vector.load %arg18[%c0_95, %c0_96] : memref<2x16xf32, #tpu.memory_space<vmem>>, vector<2x16xf32>
      tpu.vector_store %arg18[%c0_95, %c0_96], %229 {strides = array<i32>} : memref<2x16xf32, #tpu.memory_space<vmem>>, vector<2x16xf32>,
    } else {
    }
    return
  }
  func.func @transform_0(%arg0: i32) -> (i32, i32) {
    %c0_i32 = arith.constant 0 : i32
    %c0_i32_0 = arith.constant 0 : i32
    %c0_i32_1 = arith.constant 0 : i32
    return %c0_i32, %c0_i32_0 : i32, i32
  }
  func.func @transform_1(%arg0: i32) -> (i32, i32) {
    %c0_i32 = arith.constant 0 : i32
    %c0_i32_0 = arith.constant 0 : i32
    %c0_i32_1 = arith.constant 0 : i32
    return %c0_i32, %c0_i32_0 : i32, i32
  }
  func.func @transform_2(%arg0: i32) -> (i32, i32, i32) {
    %c0_i32 = arith.constant 0 : i32
    %c0_i32_0 = arith.constant 0 : i32
    %c0_i32_1 = arith.constant 0 : i32
    return %arg0, %c0_i32, %c0_i32_0 : i32, i32, i32
  }
  func.func @transform_3(%arg0: i32) -> (i32, i32, i32) {
    %c0_i32 = arith.constant 0 : i32
    %c0_i32_0 = arith.constant 0 : i32
    %c0_i32_1 = arith.constant 0 : i32
    return %arg0, %c0_i32, %c0_i32_0 : i32, i32, i32
  }
  func.func @transform_4(%arg0: i32) -> (i32, i32, i32) {
    %c0_i32 = arith.constant 0 : i32
    %c0_i32_0 = arith.constant 0 : i32
    %c0_i32_1 = arith.constant 0 : i32
    return %arg0, %c0_i32, %c0_i32_0 : i32, i32, i32
  }
  func.func @transform_5(%arg0: i32) -> (i32, i32, i32) {
    %c0_i32 = arith.constant 0 : i32
    %c0_i32_0 = arith.constant 0 : i32
    %c0_i32_1 = arith.constant 0 : i32
    return %arg0, %c0_i32, %c0_i32_0 : i32, i32, i32
  }
  func.func @transform_6(%arg0: i32) -> (i32, i32, i32) {
    %c0_i32 = arith.constant 0 : i32
    %c0_i32_0 = arith.constant 0 : i32
    %c0_i32_1 = arith.constant 0 : i32
    return %arg0, %c0_i32, %c0_i32_0 : i32, i32, i32
  }
  func.func @transform_7(%arg0: i32) -> (i32, i32, i32) {
    %c0_i32 = arith.constant 0 : i32
    %c0_i32_0 = arith.constant 0 : i32
    %c0_i32_1 = arith.constant 0 : i32
    return %arg0, %c0_i32, %c0_i32_0 : i32, i32, i32
  }
  func.func @transform_8(%arg0: i32) -> (i32, i32, i32) {
    %c0_i32 = arith.constant 0 : i32
    %c0_i32_0 = arith.constant 0 : i32
    %c0_i32_1 = arith.constant 0 : i32
    return %arg0, %c0_i32, %c0_i32_0 : i32, i32, i32
  }
  func.func @transform_9(%arg0: i32) -> (i32, i32, i32) {
    %c0_i32 = arith.constant 0 : i32
    %c0_i32_0 = arith.constant 0 : i32
    %c0_i32_1 = arith.constant 0 : i32
    return %arg0, %c0_i32, %c0_i32_0 : i32, i32, i32
  }
  func.func @transform_10(%arg0: i32) -> (i32, i32, i32) {
    %c0_i32 = arith.constant 0 : i32
    %c0_i32_0 = arith.constant 0 : i32
    %c0_i32_1 = arith.constant 0 : i32
    return %arg0, %c0_i32, %c0_i32_0 : i32, i32, i32
  }
  func.func @transform_11(%arg0: i32) -> (i32, i32, i32) {
    %c0_i32 = arith.constant 0 : i32
    %c0_i32_0 = arith.constant 0 : i32
    %c0_i32_1 = arith.constant 0 : i32
    return %arg0, %c0_i32, %c0_i32_0 : i32, i32, i32
  }
  func.func @transform_12(%arg0: i32) -> (i32, i32, i32) {
    %c0_i32 = arith.constant 0 : i32
    %c0_i32_0 = arith.constant 0 : i32
    %c0_i32_1 = arith.constant 0 : i32
    return %arg0, %c0_i32, %c0_i32_0 : i32, i32, i32
  }
  func.func @transform_13(%arg0: i32) -> (i32, i32, i32) {
    %c0_i32 = arith.constant 0 : i32
    %c0_i32_0 = arith.constant 0 : i32
    %c0_i32_1 = arith.constant 0 : i32
    return %arg0, %c0_i32, %c0_i32_0 : i32, i32, i32
  }
  func.func @transform_14(%arg0: i32) -> (i32, i32) {
    %c0_i32 = arith.constant 0 : i32
    %c0_i32_0 = arith.constant 0 : i32
    %c0_i32_1 = arith.constant 0 : i32
    return %c0_i32, %c0_i32_0 : i32, i32
  }
  func.func @transform_15(%arg0: i32) -> (i32, i32) {
    %c0_i32 = arith.constant 0 : i32
    %c0_i32_0 = arith.constant 0 : i32
    %c0_i32_1 = arith.constant 0 : i32
    return %c0_i32, %c0_i32_0 : i32, i32
  }
  func.func @transform_16(%arg0: i32) -> (i32, i32) {
    %c0_i32 = arith.constant 0 : i32
    %c0_i32_0 = arith.constant 0 : i32
    %c0_i32_1 = arith.constant 0 : i32
    return %c0_i32, %c0_i32_0 : i32, i32
  }
  func.func @transform_17(%arg0: i32) -> (i32, i32) {
    %c0_i32 = arith.constant 0 : i32
    %c0_i32_0 = arith.constant 0 : i32
    %c0_i32_1 = arith.constant 0 : i32
    return %c0_i32, %c0_i32_0 : i32, i32
  }
  func.func @transform_18(%arg0: i32) -> (i32, i32, i32) {
    %c0_i32 = arith.constant 0 : i32
    %c0_i32_0 = arith.constant 0 : i32
    %c0_i32_1 = arith.constant 0 : i32
    return %arg0, %c0_i32, %c0_i32_0 : i32, i32, i32
  }
}

</mosaic_0001>

<bundles_post_ra>
// kernel: tpu_custom_call.1
= control target key start
LH: loop header
LB: loop body
LE: loop exit
PB: predicated region body
PF: predicated region fallthrough
CT: control target
= control target key end

     0   :  { %s2929_s0 = inlined_call_operand.vmem [shape: f32[24,32], index: 0, kind: input, shape index: {}]   ;;  %s2930_s1 = inlined_call_operand.vmem [shape: f32[24,24], index: 1, kind: input, shape index: {}]   ;;  %s2931_s2 = inlined_call_operand.vmem [shape: f32[2,1,32], index: 2, kind: input, shape index: {}]   ;;  %s2932_s3 = inlined_call_operand.vmem [shape: f32[2,1,32], index: 3, kind: input, shape index: {}]   ;;  %s2933_s4 = inlined_call_operand.vmem [shape: bf16[2,32,96], index: 4, kind: input, shape index: {}]   ;;  %s2934_s5 = inlined_call_operand.vmem [shape: f32[2,1,96], index: 5, kind: input, shape index: {}]   ;;  %s2935_s6 = inlined_call_operand.vmem [shape: bf16[2,32,32], index: 6, kind: input, shape index: {}]   ;;  %s2936_s7 = inlined_call_operand.vmem [shape: f32[2,1,32], index: 7, kind: input, shape index: {}]   ;;  %s2937_s8 = inlined_call_operand.vmem [shape: f32[2,1,32], index: 8, kind: input, shape index: {}]   ;;  %s2938_s9 = inlined_call_operand.vmem [shape: f32[2,1,32], index: 9, kind: input, shape index: {}]   ;;  %s2939_s10 = inlined_call_operand.vmem [shape: bf16[2,32,128], index: 10, kind: input, shape index: {}]   ;;  %s2940_s11 = inlined_call_operand.vmem [shape: f32[2,1,128], index: 11, kind: input, shape index: {}]   ;;  %s2941_s12 = inlined_call_operand.vmem [shape: bf16[2,128,32], index: 12, kind: input, shape index: {}]   ;;  %s2942_s13 = inlined_call_operand.vmem [shape: f32[2,1,32], index: 13, kind: input, shape index: {}]   ;;  %s2943_s14 = inlined_call_operand.vmem [shape: f32[1,32], index: 14, kind: input, shape index: {}]   ;;  %s2944_s15 = inlined_call_operand.vmem [shape: f32[1,32], index: 15, kind: input, shape index: {}]   ;;  %s2945_s16 = inlined_call_operand.vmem [shape: bf16[32,16], index: 16, kind: input, shape index: {}]   ;;  %s2946_s17 = inlined_call_operand.hbm [shape: f32[2,16], index: 17, kind: output, shape index: {0}]   ;;  %s2947_s18 = inlined_call_operand.hbm [shape: f32[2,2,32], index: 18, kind: output, shape index: {1}]  }
   0x1   :  { %2962 = sst [smem:[#allocation17_spill]] %s2929_s0 }
   0x2   :  { %2963 = sst [smem:[#allocation18_spill]] %s2930_s1 }
   0x3   :  { %2964 = sst [smem:[#allocation19_spill]] %s2931_s2 }
   0x4   :  { %2965 = sst [smem:[#allocation20_spill]] %s2933_s4 }
   0x5   :  { %2966 = sst [smem:[#allocation21_spill]] %s2935_s6 }
   0x6   :  { %2967 = sst [smem:[#allocation22_spill]] %s2943_s14 }
   0x7   :  { %2968 = sst [smem:[#allocation23_spill]] %s2944_s15 }
   0x8   :  { %2969 = sst [smem:[#allocation24_spill]] %s2945_s16 }
   0x9   :  { %2970 = sst [smem:[#allocation25_spill]] %s2946_s17 }
   0xa   :  { %2971 = sst [smem:[#allocation26_spill]] %s2947_s18 }
   0xb   :  { %24 = vsyncpa [#allocation4], 0 }
   0xc   :  { %25 = vsyncpa [#allocation6], 0 }
   0xd   :  { %27 = vsyncpa [#allocation6 + $0x1], 0  ;;  %s2461_s27 = smov 0   ;;  %s2463_s28 = smov 0  }
   0xe   :  { %s2465_s29 = smov 0   ;;  %s2467_s30 = smov 0  }
   0xf LB: > { %2972 = sst [smem:[#allocation9_spill]] %s2336_s27  ;;  %s2482_s0 = sadd.s32 4294967295, %s2348_s30   ;;  %s2348_s30 = sphi %s2467_s30, %s3003_s30   ;;  %s2344_s29 = sphi %s2465_s29, %s3006_s29   ;;  %s2340_s28 = sphi %s2463_s28, %s3005_s28   ;;  %s2336_s27 = sphi %s2461_s27, %s3004_s27  }
  0x10   : > { %2973 = sst [smem:[#allocation10_spill]] %s2340_s28  ;;  %s1970_s19 = sadd.s32 4294967294, %s2348_s30  }
  0x11   : > { %2974 = sst [smem:[#allocation11_spill]] %s2344_s29  ;;  %s2486_s1 = sadd.s32 1, %s2348_s30  }
  0x12   : > { %2975 = sst [smem:[#allocation12_spill]] %s2348_s30  ;;  %s478_s20 = sadd.s32 1, %s2344_s29 }
  0x13   : > { %2976 = sst [smem:[#allocation13_spill]] %s2486_s1  ;;  %s475_s21 = ssub.s32 %s2348_s30, %s2486_s1 }
  0x14   : > { %p488_p0 = scmp.ne.s32.totalorder %s2344_s29, %s2340_s28  ;;  %p476_p1 = scmp.eq.s32.totalorder %s475_s21, 0 }
  0x15   : > { %p489_p2 = scmp.eq.s32.totalorder %s2482_s0, 1  ;;  %p494_p3 = scmp.ne.s32.totalorder %s2340_s28, %s2336_s27 }
  0x16   : > { %p495_p4 = scmp.eq.s32.totalorder %s1970_s19, 1  ;;  %p1973_p7 = scmp.ge.s32.totalorder %s2348_s30, 1 }
  0x17   : > { %s2497_s22 = scalar_select %p476_p1, %s2344_s29, %s478_s20  }
  0x18   : > { %p2501_p5 = por %p489_p2, %p488_p0  ;;  %p2505_p6 = por %p495_p4, %p494_p3 }
  0x19   : > { %2977 = sst [smem:[#allocation14_spill]] %s2497_s22  ;;  %p608_p8 = scmp.lt.s32.totalorder %s2348_s30, 3 }
  0x1a   : > { %s2978_s2 = scalar_select %p2501_p5, 1, 0 }
  0x1b   : > { %s2980_s23 = scalar_select %p2505_p6, 1, 0 }
  0x1c   : > { %2979 = sst [smem:[#allocation15_spill]] %s2978_s2  ;;  %p609_p9 = pnand %p1973_p7, %p608_p8 }
  0x1d   : > { %2981 = sst [smem:[#allocation16_spill]] %s2980_s23  ;;  %s2951_s24 = sand.u32 (!%p609_p9), 1, %s2340_s28  }
  0x1e   : > { %612 = sbr.rel (%p609_p9) target bundleno = 3000 (0xbb8), region = 88  ;;  %p701_p10 = scmp.lt.s32.totalorder (!%p609_p9), %s2482_s0, 1 }
  0x1f   : > { %s2515_s25 = sshll.u32 (!%p609_p9), %s2951_s24, 1  ;;  %s2983_s4 = sld [smem:[#allocation20_spill]] (!%p609_p9) }
  0x20   : > { %s2984_s6 = sld [smem:[#allocation21_spill]] (!%p609_p9)  ;;  %s700_s30 = scalar_lea.vmem (!%p609_p9), [#allocation5], %s2515_s25 }
  0x21   : > { %p1983_p11 = scmp.ne.s32.totalorder (!%p609_p9), %s2482_s0, 0 }
  0x23   : > { %s2518_s26 = scalar_select %p701_p10, %s2482_s0, 1 }
  0x24   : > { %s2985_s20 = sld [smem:[#allocation17_spill]] (!%p1983_p11) }
  0x25   : > { %s2078_s23 = sshll.u32 %s2518_s26, 4  ;;  %s725_s14 = scalar_lea.vmem %s2937_s8, %s2518_s26 }
  0x26   : > { %s2536_s2 = scalar_lea.vmem %s2983_s4, %s2078_s23  ;;  %s2541_s15 = scalar_lea.vmem %s2984_s6, %s2078_s23 }
  0x27   : > { %s728_s18 = scalar_lea.vmem %s2938_s9, %s2518_s26  ;;  %s2558_s4 = scalar_lea.vmem %s2939_s10, %s2078_s23 }
  0x28   : > { %s736_s6 = scalar_lea.vmem %s2940_s11, %s2518_s26  ;;  %s2081_s16 = sshll.u32 %s2518_s26, 6 }
  0x29   : > { %s2568_s29 = scalar_lea.vmem %s2941_s12, %s2081_s16  ;;  %s744_s27 = scalar_lea.vmem %s2942_s13, %s2518_s26 }
  0x2a   : > { %749 = sbr.rel (%p1983_p11) target bundleno = 51 (0x33), region = 92 }
  0x2f   : > { %v750_v0 = vld [vmem:[%s2985_s20] sm:$0xff]  ;;  %vm753_vm0 = vcmask 261120   ;;  %v751_v1 = vld [vmem:[%s2985_s20 + $0x8] sm:$0xff]  ;;  %v752_v2 = vld [vmem:[%s2985_s20 + $0x10] sm:$0xff] }
  0x30   : > { %754 = vst.msk [vmem:[#allocation2] sm:$0xff] %vm753_vm0, %v750_v0 }
  0x31   : > { %755 = vst.msk [vmem:[#allocation2 + $0x8] sm:$0xff] %vm753_vm0, %v751_v1 }
  0x32   : > { %756 = vst.msk [vmem:[#allocation2 + $0x10] sm:$0xff] %vm753_vm0, %v752_v2 }
  0x33 PF: > { %vm765_vm1 = vcmask 261120   ;;  %v2350_v9 = vmov 32.0   ;;  %v2083_v31 = vld [vmem:[%s2536_s2 + $0x8] sm:$0xff]  ;;  %v2082_v34 = vld [vmem:[%s2536_s2] sm:$0xff]  ;;  %s2986_s1 = sld [smem:[#allocation19_spill]]  ;;  %s2988_s17 = scalar_lea.vmem %s2932_s3, %s2518_s26  ;;  %vm905_vm12 = vcmask 64512  }
  0x34   : > { %2182 = vrcp.f32 %v2350_v9  ;;  %885 = vmatpush.bf16.msra.mxu0 %v2083_v31  ;;  %v2175_v63 = vld [vmem:[%s2988_s17] ss:$0 sm:$0xff]  ;;  %s2989_s16 = scalar_lea.vmem %s2934_s5, %s2518_s26  ;;  %s2351_s2 = smov 96   ;;  %vm989_vm13 = vcmask 1043456   ;;  %vm942_vm14 = vcmask 195584   ;;  %vm1383_vm15 = vcmask 130048  }
  0x35   : > { %s2352_s21 = smov 88   ;;  %s2990_s17 = sld [smem:[#allocation18_spill]] }
  0x36   : > { %s2357_s23 = smov 104   ;;  %s2358_s19 = smov 112  }
  0x37   : > { %v2585_v3 = vld [vmem:[#allocation2] sm:$0xff]  ;;  %s2360_s28 = smov 48   ;;  %s2361_s22 = smov 40  }
  0x38   : > { %v766_v5 = vsel %vm765_vm1, %v2585_v3, 0.0  ;;  %v2593_v7 = vld [vmem:[#allocation2 + $0x8] sm:$0xff]  ;;  %886 = vmatpush.bf16.msra.mxu0 %v2082_v34  ;;  %p2062_p12 = scmp.ne.s32.totalorder %s2482_s0, 1 }
  0x39   : > { %v2587_v4 = vld [vmem:[#allocation2 + $0x10] sm:$0xff]  ;;  %767 = vadd.xlane.f32.xlu0 %v766_v5  ;;  %v769_v8 = vsel %vm765_vm1, %v2593_v7, 0.0  ;;  %s2987_s24 = scalar_lea.vmem %s2986_s1, %s2518_s26  ;;  %s2353_s1 = smov 64  }
  0x3a   : > { %v772_v6 = vsel %vm765_vm1, %v2587_v4, 0.0  ;;  %v2183_v10 = vpop.eup %2182  ;;  %v2174_v56 = vld [vmem:[%s2987_s24] ss:$0 sm:$0xff]  ;;  %s2354_s24 = smov 120  }
  0x3b   : > { %773 = vadd.xlane.f32.xlu1 %v772_v6  ;;  %v776_v11 = vmul.f32 32.0, %v2183_v10  ;;  %vm780_vm2 = vweird.f32 %v2183_v10 }
  0x3d   : > { %v777_v12 = vsub.f32 1.0, %v776_v11 }
  0x3f   : > { %v778_v13 = vmul.f32 %v2183_v10, %v777_v12 }
  0x41   : > { %770 = vadd.xlane.f32.xlu0 %v769_v8  ;;  %v779_v14 = vadd.f32 %v2183_v10, %v778_v13 }
  0x43   : > { %v2597_v15 = vsel %vm780_vm2, %v2183_v10, %v779_v14 }
  0xac   : > { %v768_v16 = vpop.xlane.xlu0 %767 }
  0xad   : > { %v782_v17 = vmul.f32 %v2597_v15, %v768_v16 }
  0xae   : > { %v774_v20 = vpop.xlane.xlu1 %773 }
  0xaf   : > { %v785_v18 = vsub.f32 %v2585_v3, %v782_v17  ;;  %v784_v24 = vmul.f32 %v2597_v15, %v774_v20  ;;  %v2176_v17 = vld [vmem:[%s2989_s16] ss:$0 sm:$0xff]  ;;  %s2362_s16 = smov 8  }
  0xb1   : > { %v788_v19 = vmul.f32 %v785_v18, %v785_v18  ;;  %v2606_v26 = vsub.f32 %v2587_v4, %v784_v24 }
  0xb3   : > { %v791_v21 = vsel %vm765_vm1, %v788_v19, 0.0  ;;  %v790_v29 = vmul.f32 %v2606_v26, %v2606_v26 }
  0xb4   : > { %792 = vadd.xlane.f32.xlu1 %v791_v21  ;;  %v771_v22 = vpop.xlane.xlu0 %770 }
  0xb5   : > { %v783_v23 = vmul.f32 %v2597_v15, %v771_v22  ;;  %v797_v30 = vsel %vm765_vm1, %v790_v29, 0.0 }
  0xb7   : > { %v786_v25 = vsub.f32 %v2593_v7, %v783_v23 }
  0xb9   : > { %v789_v27 = vmul.f32 %v786_v25, %v786_v25 }
  0xbb   : > { %v794_v28 = vsel %vm765_vm1, %v789_v27, 0.0 }
  0xbc   : > { %795 = vadd.xlane.f32.xlu2 %v794_v28 }
  0xc4   : > { %798 = vadd.xlane.f32.xlu2 %v797_v30 }
 0x127   : > { %v793_v32 = vpop.xlane.xlu1 %792 }
 0x128   : > { %v800_v33 = vmul.f32 %v793_v32, %v2597_v15 }
 0x12a   : > { %v803_v35 = vadd.f32 1e-05, %v800_v33 }
 0x12c   : > { %2184 = vrsqrt.f32 %v803_v35  ;;  %vm812_vm4 = vweird.f32 %v803_v35 }
 0x12f   : > { %v796_v36 = vpop.xlane.xlu2 %795 }
 0x130   : > { %v801_v37 = vmul.f32 %v796_v36, %v2597_v15  ;;  %v2658_v36 = vld [vmem:[%s2990_s17] sm:$0xff] }
 0x132   : > { %v2185_v38 = vpop.eup %2184  ;;  %v804_v39 = vadd.f32 1e-05, %v801_v37 }
 0x133   : > { %v807_v40 = vmul.f32 %v2185_v38, %v803_v35  ;;  %vm813_vm3 = vweird.f32 %v2185_v38 }
 0x134   : > { %2186 = vrsqrt.f32 %v804_v39  ;;  %vm814_vm5 = vmor %vm812_vm4, %vm813_vm3  ;;  %vm822_vm7 = vweird.f32 %v804_v39 }
 0x135   : > { %v808_v41 = vmul.f32 %v2185_v38, %v807_v40 }
 0x137   : > { %v809_v42 = vmul.f32 0.5, %v808_v41  ;;  %v799_v43 = vpop.xlane.xlu2 %798  ;;  %v2665_v41 = vld [vmem:[%s2990_s17 + $0x8] sm:$0xff] }
 0x138   : > { %v802_v44 = vmul.f32 %v799_v43, %v2597_v15 }
 0x139   : > { %v810_v45 = vsub.f32 1.5, %v809_v42 }
 0x13a   : > { %v2187_v46 = vpop.eup %2186  ;;  %v805_v47 = vadd.f32 1e-05, %v802_v44 }
 0x13b   : > { %v811_v48 = vmul.f32 %v2185_v38, %v810_v45  ;;  %v817_v49 = vmul.f32 %v2187_v46, %v804_v39  ;;  %vm823_vm6 = vweird.f32 %v2187_v46 }
 0x13c   : > { %2188 = vrsqrt.f32 %v805_v47  ;;  %vm824_vm8 = vmor %vm822_vm7, %vm823_vm6  ;;  %vm832_vm9 = vweird.f32 %v805_v47 }
 0x13d   : > { %v818_v50 = vmul.f32 %v2187_v46, %v817_v49  ;;  %v815_v51 = vsel %vm814_vm5, %v2185_v38, %v811_v48  ;;  %v2674_v48 = vld [vmem:[%s2990_s17 + $0x10] sm:$0xff] }
 0x13e   : > { %v836_v55 = vmul.f32 %v815_v51, %v785_v18 }
 0x13f   : > { %v819_v52 = vmul.f32 0.5, %v818_v50 }
 0x140   : > { %v842_v62 = vmul.f32 %v2174_v56, %v836_v55 }
 0x141   : > { %v820_v53 = vsub.f32 1.5, %v819_v52 }
 0x142   : > { %v2189_v54 = vpop.eup %2188  ;;  %v848_v5 = vadd.f32 %v2175_v63, %v842_v62 }
 0x143   : > { %v821_v57 = vmul.f32 %v2187_v46, %v820_v53  ;;  %v827_v58 = vmul.f32 %v2189_v54, %v805_v47  ;;  %vm833_vm10 = vweird.f32 %v2189_v54 }
 0x144   : > { %vm834_vm11 = vmor %vm832_vm9, %vm833_vm10  ;;  %vm1686_vm10 = vcmask 1040384  }
 0x145   : > { %v825_v59 = vsel %vm824_vm8, %v2187_v46, %v821_v57  ;;  %v828_v60 = vmul.f32 %v2189_v54, %v827_v58 }
 0x146   : > { %v837_v61 = vmul.f32 %v825_v59, %v786_v25 }
 0x147   : > { %v829_v0 = vmul.f32 0.5, %v828_v60 }
 0x148   : > { %v843_v1 = vmul.f32 %v2174_v56, %v837_v61 }
 0x149   : > { %v830_v2 = vsub.f32 1.5, %v829_v0 }
 0x14a   : > { %v849_v6 = vadd.f32 %v2175_v63, %v843_v1 }
 0x14b   : > { %v831_v8 = vmul.f32 %v2189_v54, %v830_v2 }
 0x14c   : > { %v851_v9 = vpack.c.bf16 %v849_v6, %v848_v5 }
 0x14d   : > { %v835_v10 = vsel %vm834_vm11, %v2189_v54, %v831_v8  ;;  %vm1688_vm11 = vcmask 254976  }
 0x14e   : > { %1992 = vmatmul.msk.bf16.vlgmr.msra.gmra.mxu0 %vm765_vm1, %v851_v9  ;;  %v838_v11 = vmul.f32 %v835_v10, %v2606_v26 }
 0x150   : > { %v844_v12 = vmul.f32 %v2174_v56, %v838_v11 }
 0x152   : > { %v850_v13 = vadd.f32 %v2175_v63, %v844_v12 }
 0x154   : > { %v852_v14 = vpack.c.bf16 %v850_v13, %v850_v13 }
 0x15e   : > { %1993 = vmatmul.msk.bf16.gmra.mxu0 %vm765_vm1, %v852_v14 }
 0x1cb   : > { %v888_v16 = vpop.f32.mrf.mxu0 }
 0x1cc   : > { %v889_v19 = vadd.f32 %v2176_v17, %v888_v16 }
 0x1d3   : > { %v890_v18 = vpop.f32.mrf.mxu0 }
 0x1d4   : > { %v891_v20 = vadd.f32 %v2176_v17, %v890_v18 }
 0x1d6   : > { %v2635_v21 = vpack.c.bf16 %v891_v20, %v889_v19 }
 0x1d8   : > { %901 = vrot.lane.b32.xlu1 %v2635_v21, %s2351_s2 }
 0x1db   : > { %v893_v22 = vpop.f32.mrf.mxu0 }
 0x1dc   : > { %v894_v23 = vadd.f32 %v2176_v17, %v893_v22 }
 0x1de   : > { %v2638_v24 = vpack.c.bf16 %v894_v23, %v894_v23 }
 0x1e0   : > { %903 = vrot.lane.b32.xlu0 %v2638_v24, %s2351_s2  ;;  %s2363_s2 = smov 16  }
 0x1e3   : > { %v895_v25 = vpop.f32.mrf.mxu0 }
 0x1e8   : > { %1017 = vrot.lane.b32.xlu0 %v2638_v24, %s2352_s21 }
 0x1f0   : > { %980 = vrot.lane.b32.xlu0 %v2638_v24, %s2353_s1 }
 0x1f8   : > { %978 = vrot.lane.b32.xlu0 %v2635_v21, %s2353_s1  ;;  %s2356_s1 = smov 72  }
 0x200   : > { %1011 = vrot.lane.b32.xlu0 %v2635_v21, %s2354_s24 }
 0x24a   : > { %v902_v28 = vpop.permute.xlu1 %901 }
 0x24b   : > { %v913_v30 = vsel %vm905_vm12, %v902_v28, 0 }
 0x252   : > { %v904_v26 = vpop.permute.xlu0 %903 }
 0x253   : > { %v916_v27 = vsel %vm905_vm12, %v904_v26, 0 }
 0x254   : > { %924 = vmatpush.bf16.xpose.msra.mxu1 %v916_v27 }
 0x25a   : > { %v1018_v29 = vpop.permute.xlu0 %1017 }
 0x25b   : > { %v1029_v31 = vsel %vm905_vm12, %v1018_v29, 0 }
 0x25c   : > { %925 = vmatpush.bf16.xpose.msra.mxu1 %v913_v30  ;;  %1037 = vmatpush.bf16.xpose.msra.mxu3 %v1029_v31 }
 0x262   : > { %v981_v32 = vpop.permute.xlu0 %980 }
 0x263   : > { %1994 = vmatmul.msk.bf16.vlgmr.msra.gmra.mxu1 %vm905_vm12, %v2635_v21  ;;  %v991_v33 = vsel %vm989_vm13, %v981_v32, 0 }
 0x264   : > { %999 = vmatpush.bf16.msra.mxu2 %v991_v33 }
 0x26a   : > { %v979_v34 = vpop.permute.xlu0 %978 }
 0x26b   : > { %1000 = vmatpush.bf16.msra.mxu2 %v979_v34 }
 0x272   : > { %v1012_v63 = vpop.permute.xlu0 %1011 }
 0x273   : > { %1995 = vmatmul.msk.bf16.gmra.mxu1 %vm905_vm12, %v2638_v24 }
 0x2e0   : > { %v927_v35 = vpop.f32.mrf.mxu1 }
 0x2e1   : > { %v936_v37 = vmul.f32 0.35355338, %v927_v35 }
 0x2e3   : > { %v939_v38 = vadd.f32 %v936_v37, %v2658_v36 }
 0x2e5   : > { %v943_v39 = vsel %vm942_vm14, %v939_v38, -inf }
 0x2e6   : > { %944 = vmax.xlane.f32.xlu2 %v943_v39 }
 0x2e8   : > { %v929_v40 = vpop.f32.mrf.mxu1 }
 0x2e9   : > { %v937_v42 = vmul.f32 0.35355338, %v929_v40 }
 0x2eb   : > { %v940_v43 = vadd.f32 %v937_v42, %v2665_v41 }
 0x2ed   : > { %v946_v44 = vsel %vm942_vm14, %v940_v43, -inf }
 0x2ee   : > { %947 = vmax.xlane.f32.xlu2 %v946_v44 }
 0x2f0   : > { %v932_v45 = vpop.f32.mrf.mxu1 }
 0x2f1   : > { %v938_v47 = vmul.f32 0.35355338, %v932_v45 }
 0x2f3   : > { %v941_v49 = vadd.f32 %v938_v47, %v2674_v48 }
 0x2f5   : > { %v949_v50 = vsel %vm942_vm14, %v941_v49, -inf }
 0x2f8   : > { %v934_v46 = vpop.f32.mrf.mxu1 }
 0x306   : > { %1015 = vrot.lane.b32.xlu2 %v2635_v21, %s2352_s21  ;;  %s2355_s21 = smov 80  }
 0x32f   : > { %950 = vmax.xlane.f32.xlu2 %v949_v50 }
 0x359   : > { %v945_v51 = vpop.xlane.xlu2 %944 }
 0x35a   : > { %v952_v52 = vsub.f32 %v939_v38, %v945_v51 }
 0x35c   : > { %v955_v53 = vmul.f32 1.442695, %v952_v52 }
 0x35e   : > { %2190 = vpow2.f32 %v955_v53 }
 0x361   : > { %v948_v54 = vpop.xlane.xlu2 %947 }
 0x362   : > { %v953_v55 = vsub.f32 %v940_v43, %v948_v54 }
 0x364   : > { %v2191_v56 = vpop.eup %2190  ;;  %v957_v57 = vmul.f32 1.442695, %v953_v55 }
 0x365   : > { %v961_v58 = vsel %vm942_vm14, %v2191_v56, 0.0 }
 0x366   : > { %2192 = vpow2.f32 %v957_v57  ;;  %962 = vadd.xlane.f32.xlu2 %v961_v58 }
 0x369   : > { %v1016_v59 = vpop.permute.xlu2 %1015 }
 0x36a   : > { %v1026_v60 = vsel %vm905_vm12, %v1016_v59, 0 }
 0x36b   : > { %1038 = vmatpush.bf16.xpose.msra.mxu3 %v1026_v60 }
 0x36c   : > { %v2193_v61 = vpop.eup %2192 }
 0x36d   : > { %v964_v62 = vsel %vm942_vm14, %v2193_v61, 0.0 }
 0x36e   : > { %965 = vadd.xlane.f32.xlu1 %v964_v62 }
 0x372   : > { %1998 = vmatmul.msk.bf16.vlgmr.msra.gmra.mxu3 %vm905_vm12, %v1012_v63 }
 0x37e   : > { %1128 = vrot.lane.b32.xlu2 %v2638_v24, %s2355_s21 }
 0x386   : > { %1013 = vrot.lane.b32.xlu2 %v2638_v24, %s2354_s24  ;;  %s2359_s24 = smov 56  }
 0x387   : > { %1239 = vrot.lane.b32.xlu1 %v2638_v24, %s2356_s1 }
 0x38e   : > { %1126 = vrot.lane.b32.xlu2 %v2635_v21, %s2355_s21  ;;  %s2364_s21 = smov 24  }
 0x38f   : > { %1233 = vrot.lane.b32.xlu1 %v2635_v21, %s2357_s23 }
 0x396   : > { %1237 = vrot.lane.b32.xlu2 %v2635_v21, %s2356_s1  ;;  %s2993_s1 = sld [smem:[#allocation22_spill]] (!%p2062_p12) }
 0x39e   : > { %1122 = vrot.lane.b32.xlu2 %v2635_v21, %s2358_s19 }
 0x3a2   : > { %v951_v0 = vpop.xlane.xlu2 %950 }
 0x3a3   : > { %v954_v1 = vsub.f32 %v941_v49, %v951_v0 }
 0x3a5   : > { %v959_v2 = vmul.f32 1.442695, %v954_v1 }
 0x3a6   : > { %1235 = vrot.lane.b32.xlu2 %v2638_v24, %s2357_s23  ;;  %s2991_s23 = scalar_lea.vmem %s2936_s7, %s2518_s26 }
 0x3a7   : > { %2194 = vpow2.f32 %v959_v2 }
 0x3ad   : > { %v2195_v5 = vpop.eup %2194 }
 0x3ae   : > { %v967_v6 = vsel %vm942_vm14, %v2195_v5, 0.0 }
 0x3af   : > { %968 = vadd.xlane.f32.xlu0 %v967_v6 }
 0x3c3   : > { %1124 = vrot.lane.b32.xlu0 %v2638_v24, %s2358_s19  ;;  %s2994_s19 = sld [smem:[#allocation23_spill]] (!%p2062_p12) }
 0x3d9   : > { %v963_v8 = vpop.xlane.xlu2 %962 }
 0x3da   : > { %2196 = vrcp.f32 %v963_v8 }
 0x3e0   : > { %v2197_v12 = vpop.eup %2196 }
 0x3e1   : > { %v966_v9 = vpop.xlane.xlu1 %965  ;;  %v1129_v10 = vpop.permute.xlu2 %1128  ;;  %v973_v16 = vmul.f32 %v2197_v12, %v2191_v56 }
 0x3e2   : > { %2198 = vrcp.f32 %v966_v9  ;;  %v1140_v11 = vsel %vm905_vm12, %v1129_v10, 0 }
 0x3e3   : > { %1148 = vmatpush.bf16.xpose.msrb.mxu2 %v1140_v11 }
 0x3e8   : > { %v2199_v13 = vpop.eup %2198 }
 0x3e9   : > { %v1014_v14 = vpop.permute.xlu2 %1013  ;;  %v974_v17 = vmul.f32 %v2199_v13, %v2193_v61 }
 0x3ea   : > { %1999 = vmatmul.msk.bf16.gmra.mxu3 %vm905_vm12, %v1014_v14 }
 0x3eb   : > { %v976_v18 = vpack.c.bf16 %v974_v17, %v973_v16 }
 0x3ed   : > { %1996 = vmatmul.msk.bf16.vlgmr.msra.gmra.mxu2 %vm942_vm14, %v976_v18 }
 0x3f1   : > { %v1127_v19 = vpop.permute.xlu2 %1126 }
 0x3f2   : > { %v1137_v20 = vsel %vm905_vm12, %v1127_v19, 0 }
 0x3f3   : > { %1149 = vmatpush.bf16.xpose.msrb.mxu2 %v1137_v20 }
 0x3f5   : > { %v1040_v22 = vpop.f32.mrf.mxu3 }
 0x3f6   : > { %v1049_v23 = vmul.f32 0.35355338, %v1040_v22 }
 0x3f8   : > { %v1052_v25 = vadd.f32 %v1049_v23, %v2658_v36 }
 0x3f9   : > { %v1240_v26 = vpop.permute.xlu1 %1239  ;;  %v1238_v31 = vpop.permute.xlu2 %1237 }
 0x3fa   : > { %v1251_v27 = vsel %vm905_vm12, %v1240_v26, 0  ;;  %v1055_v28 = vsel %vm942_vm14, %v1052_v25, -inf  ;;  %v1248_v33 = vsel %vm905_vm12, %v1238_v31, 0 }
 0x3fb   : > { %1259 = vmatpush.bf16.xpose.msrb.mxu3 %v1251_v27  ;;  %1056 = vmax.xlane.f32.xlu1 %v1055_v28 }
 0x3fd   : > { %v1042_v29 = vpop.f32.mrf.mxu3 }
 0x3fe   : > { %v1050_v30 = vmul.f32 0.35355338, %v1042_v29 }
 0x400   : > { %v1053_v32 = vadd.f32 %v1050_v30, %v2665_v41 }
 0x401   : > { %v1234_v35 = vpop.permute.xlu1 %1233  ;;  %v1123_v37 = vpop.permute.xlu2 %1122 }
 0x402   : > { %v1058_v34 = vsel %vm942_vm14, %v1053_v32, -inf }
 0x403   : > { %1260 = vmatpush.bf16.xpose.msrb.mxu3 %v1248_v33  ;;  %1059 = vmax.xlane.f32.xlu2 %v1058_v34 }
 0x409   : > { %v1236_v38 = vpop.permute.xlu2 %1235 }
 0x40a   : > { %2006 = vmatmul.msk.bf16.vlgmr.msrb.gmra.mxu3 %vm905_vm12, %v1234_v35 }
 0x41a   : > { %2007 = vmatmul.msk.bf16.gmra.mxu3 %vm905_vm12, %v1236_v38 }
 0x422   : > { %v969_v39 = vpop.xlane.xlu0 %968 }
 0x423   : > { %2200 = vrcp.f32 %v969_v39 }
 0x429   : > { %v2201_v40 = vpop.eup %2200 }
 0x42a   : > { %v975_v42 = vmul.f32 %v2201_v40, %v2195_v5 }
 0x42c   : > { %v977_v43 = vpack.c.bf16 %v975_v42, %v975_v42 }
 0x42e   : > { %1997 = vmatmul.msk.bf16.gmra.mxu2 %vm942_vm14, %v977_v43 }
 0x435   : > { %v1125_v44 = vpop.permute.xlu0 %1124 }
 0x43e   : > { %2002 = vmatmul.msk.bf16.vlgmr.msrb.gmra.mxu2 %vm905_vm12, %v1123_v37 }
 0x44e   : > { %2003 = vmatmul.msk.bf16.gmra.mxu2 %vm905_vm12, %v1125_v44 }
 0x46d   : > { %v1045_v45 = vpop.f32.mrf.mxu3 }
 0x46e   : > { %v1051_v46 = vmul.f32 0.35355338, %v1045_v45  ;;  %v1057_v47 = vpop.xlane.xlu1 %1056 }
 0x46f   : > { %v1064_v49 = vsub.f32 %v1052_v25, %v1057_v47 }
 0x470   : > { %v1054_v50 = vadd.f32 %v1051_v46, %v2674_v48  ;;  %v2724_v9 = vpop.f32.mrf.mxu2 }
 0x471   : > { %v1067_v51 = vmul.f32 1.442695, %v1064_v49 }
 0x472   : > { %v1061_v52 = vsel %vm942_vm14, %v1054_v50, -inf }
 0x473   : > { %2202 = vpow2.f32 %v1067_v51  ;;  %1062 = vmax.xlane.f32.xlu0 %v1061_v52 }
 0x475   : > { %v1047_v53 = vpop.f32.mrf.mxu3 }
 0x476   : > { %v1060_v56 = vpop.xlane.xlu2 %1059 }
 0x477   : > { %v1065_v57 = vsub.f32 %v1053_v32, %v1060_v56 }
 0x478   : > { %v2726_v11 = vpop.f32.mrf.mxu2 }
 0x479   : > { %v2710_v54 = vpop.eup %2202  ;;  %v1069_v58 = vmul.f32 1.442695, %v1065_v57 }
 0x47a   : > { %v1073_v55 = vsel %vm942_vm14, %v2710_v54, 0.0 }
 0x47b   : > { %1074 = vadd.xlane.f32.xlu0 %v1073_v55  ;;  %2204 = vpow2.f32 %v1069_v58 }
 0x481   : > { %v2718_v1 = vpop.eup %2204 }
 0x482   : > { %v1076_v5 = vsel %vm942_vm14, %v2718_v1, 0.0 }
 0x48d   : > { %v1262_v59 = vpop.f32.mrf.mxu3 }
 0x48e   : > { %v1271_v60 = vmul.f32 0.35355338, %v1262_v59 }
 0x48f   : > { %1090 = vrot.lane.b32.xlu0 %v2635_v21, %s2359_s24 }
 0x490   : > { %v1274_v61 = vadd.f32 %v1271_v60, %v2658_v36 }
 0x492   : > { %v1277_v62 = vsel %vm942_vm14, %v1274_v61, -inf }
 0x493   : > { %1278 = vmax.xlane.f32.xlu1 %v1277_v62 }
 0x495   : > { %v1264_v63 = vpop.f32.mrf.mxu3 }
 0x496   : > { %v1272_v0 = vmul.f32 0.35355338, %v1264_v63 }
 0x498   : > { %v1275_v2 = vadd.f32 %v1272_v0, %v2665_v41 }
 0x49a   : > { %v1280_v6 = vsel %vm942_vm14, %v1275_v2, -inf }
 0x49b   : > { %1077 = vadd.xlane.f32.xlu1 %v1076_v5  ;;  %1281 = vmax.xlane.f32.xlu2 %v1280_v6 }
 0x49d   : > { %v1267_v8 = vpop.f32.mrf.mxu3 }
 0x49e   : > { %v1273_v30 = vmul.f32 0.35355338, %v1267_v8 }
 0x4a0   : > { %v2738_v32 = vadd.f32 %v1273_v30, %v2674_v48 }
 0x4a5   : > { %v1269_v10 = vpop.f32.mrf.mxu3 }
 0x4b1   : > { %v2728_v12 = vpop.f32.mrf.mxu2 }
 0x4b9   : > { %v1009_v13 = vpop.f32.mrf.mxu2 }
 0x4c1   : > { %v1151_v14 = vpop.f32.mrf.mxu2 }
 0x4c2   : > { %v1160_v16 = vmul.f32 0.35355338, %v1151_v14 }
 0x4c4   : > { %v1163_v17 = vadd.f32 %v1160_v16, %v2658_v36 }
 0x4c6   : > { %v1166_v18 = vsel %vm942_vm14, %v1163_v17, -inf }
 0x4c7   : > { %1167 = vmax.xlane.f32.xlu1 %v1166_v18 }
 0x4c9   : > { %v1153_v19 = vpop.f32.mrf.mxu2 }
 0x4ca   : > { %v1161_v20 = vmul.f32 0.35355338, %v1153_v19 }
 0x4cc   : > { %v1164_v22 = vadd.f32 %v1161_v20, %v2665_v41  ;;  %v1283_v41 = vsel %vm942_vm14, %v2738_v32, -inf }
 0x4ce   : > { %v1169_v23 = vsel %vm942_vm14, %v1164_v22, -inf }
 0x4cf   : > { %1170 = vmax.xlane.f32.xlu2 %v1169_v23 }
 0x4d1   : > { %v1156_v25 = vpop.f32.mrf.mxu2 }
 0x4d2   : > { %v1162_v6 = vmul.f32 0.35355338, %v1156_v25 }
 0x4d4   : > { %v1165_v8 = vadd.f32 %v1162_v6, %v2674_v48 }
 0x4d6   : > { %v1172_v10 = vsel %vm942_vm14, %v1165_v8, -inf }
 0x4d9   : > { %v1158_v26 = vpop.f32.mrf.mxu2 }
 0x4e6   : > { %v1063_v27 = vpop.xlane.xlu0 %1062 }
 0x4e7   : > { %v1066_v28 = vsub.f32 %v1054_v50, %v1063_v27  ;;  %1092 = vrot.lane.b32.xlu2 %v2638_v24, %s2359_s24 }
 0x4e9   : > { %v1071_v29 = vmul.f32 1.442695, %v1066_v28 }
 0x4eb   : > { %2206 = vpow2.f32 %v1071_v29 }
 0x4ee   : > { %v1075_v51 = vpop.xlane.xlu0 %1074 }
 0x4f1   : > { %v2207_v36 = vpop.eup %2206 }
 0x4f2   : > { %v1079_v31 = vsel %vm942_vm14, %v2207_v36, 0.0 }
 0x4f3   : > { %1080 = vadd.xlane.f32.xlu1 %v1079_v31 }
 0x4fb   : > { %1284 = vmax.xlane.f32.xlu1 %v1283_v41 }
 0x506   : > { %v1279_v33 = vpop.xlane.xlu1 %1278 }
 0x507   : > { %v1286_v34 = vsub.f32 %v1274_v61, %v1279_v33 }
 0x509   : > { %v1289_v35 = vmul.f32 1.442695, %v1286_v34 }
 0x50b   : > { %2208 = vpow2.f32 %v1289_v35 }
 0x50e   : > { %v1282_v37 = vpop.xlane.xlu2 %1281  ;;  %v1078_v45 = vpop.xlane.xlu1 %1077 }
 0x50f   : > { %v1287_v38 = vsub.f32 %v1275_v2, %v1282_v37  ;;  %v1091_v2 = vpop.permute.xlu0 %1090 }
 0x511   : > { %v2742_v39 = vpop.eup %2208  ;;  %v1291_v40 = vmul.f32 1.442695, %v1287_v38 }
 0x512   : > { %v1295_v42 = vsel %vm942_vm14, %v2742_v39, 0.0 }
 0x513   : > { %2210 = vpow2.f32 %v1291_v40  ;;  %1296 = vadd.xlane.f32.xlu1 %v1295_v42 }
 0x519   : > { %v2211_v43 = vpop.eup %2210 }
 0x51a   : > { %v1298_v44 = vsel %vm942_vm14, %v2211_v43, 0.0 }
 0x51b   : > { %1299 = vadd.xlane.f32.xlu1 %v1298_v44 }
 0x534   : > { %1203 = vrot.lane.b32.xlu1 %v2638_v24, %s2360_s28 }
 0x53a   : > { %v1168_v46 = vpop.xlane.xlu1 %1167 }
 0x53b   : > { %v1175_v47 = vsub.f32 %v1163_v17, %v1168_v46 }
 0x53d   : > { %v1178_v49 = vmul.f32 1.442695, %v1175_v47 }
 0x53f   : > { %2212 = vpow2.f32 %v1178_v49 }
 0x540   : > { %2214 = vrcp.f32 %v1078_v45 }
 0x541   : > { %2216 = vrcp.f32 %v1075_v51 }
 0x542   : > { %v1171_v50 = vpop.xlane.xlu2 %1170 }
 0x543   : > { %v1176_v52 = vsub.f32 %v1164_v22, %v1171_v50 }
 0x545   : > { %v2213_v53 = vpop.eup %2212  ;;  %v1180_v55 = vmul.f32 1.442695, %v1176_v52 }
 0x546   : > { %v1184_v56 = vsel %vm942_vm14, %v2213_v53, 0.0  ;;  %v2215_v57 = vpop.eup %2214 }
 0x547   : > { %2218 = vpow2.f32 %v1180_v55  ;;  %1185 = vadd.xlane.f32.xlu0 %v1184_v56  ;;  %v2217_v60 = vpop.eup %2216  ;;  %v1086_v62 = vmul.f32 %v2215_v57, %v2718_v1 }
 0x548   : > { %v1085_v0 = vmul.f32 %v2217_v60, %v2710_v54 }
 0x54a   : > { %v1093_v58 = vpop.permute.xlu2 %1092  ;;  %v1088_v5 = vpack.c.bf16 %v1086_v62, %v1085_v0 }
 0x54b   : > { %v1102_v59 = vsel %vm989_vm13, %v1093_v58, 0 }
 0x54c   : > { %1110 = vmatpush.bf16.msrb.mxu0 %v1102_v59 }
 0x54d   : > { %v2219_v61 = vpop.eup %2218 }
 0x54e   : > { %v1187_v63 = vsel %vm942_vm14, %v2219_v61, 0.0 }
 0x54f   : > { %1188 = vadd.xlane.f32.xlu2 %v1187_v63 }
 0x550   : > { %1111 = vmatpush.bf16.msrb.mxu0 %v1091_v2 }
 0x553   : > { %2000 = vmatmul.msk.bf16.vlgmr.msrb.gmra.mxu0 %vm942_vm14, %v1088_v5 }
 0x55b   : > { %1314 = vrot.lane.b32.xlu0 %v2638_v24, %s2361_s22 }
 0x55e   : > { %1173 = vmax.xlane.f32.xlu1 %v1172_v10  ;;  %v2084_v10 = vld [vmem:[%s2541_s15] sm:$0xff] }
 0x566   : > { %v1081_v1 = vpop.xlane.xlu1 %1080 }
 0x567   : > { %2220 = vrcp.f32 %v1081_v1  ;;  %1201 = vrot.lane.b32.xlu2 %v2635_v21, %s2360_s28 }
 0x56d   : > { %v2221_v54 = vpop.eup %2220 }
 0x56e   : > { %v1087_v13 = vmul.f32 %v2221_v54, %v2207_v36  ;;  %v1285_v14 = vpop.xlane.xlu1 %1284 }
 0x56f   : > { %v1288_v17 = vsub.f32 %v2738_v32, %v1285_v14 }
 0x570   : > { %v1089_v16 = vpack.c.bf16 %v1087_v13, %v1087_v13 }
 0x571   : > { %v1293_v48 = vmul.f32 1.442695, %v1288_v17 }
 0x572   : > { %2001 = vmatmul.msk.bf16.gmra.mxu0 %vm942_vm14, %v1089_v16 }
 0x573   : > { %2222 = vpow2.f32 %v1293_v48 }
 0x577   : > { %1312 = vrot.lane.b32.xlu1 %v2635_v21, %s2361_s22  ;;  %s2992_s22 = sld [smem:[#allocation24_spill]] (!%p2062_p12) }
 0x579   : > { %v2223_v24 = vpop.eup %2222 }
 0x57a   : > { %v1301_v18 = vsel %vm942_vm14, %v2223_v24, 0.0 }
 0x585   : > { %1302 = vadd.xlane.f32.xlu0 %v1301_v18 }
 0x586   : > { %v1297_v19 = vpop.xlane.xlu1 %1296 }
 0x587   : > { %2224 = vrcp.f32 %v1297_v19 }
 0x58d   : > { %v2225_v22 = vpop.eup %2224 }
 0x58e   : > { %v1300_v20 = vpop.xlane.xlu1 %1299  ;;  %v1307_v25 = vmul.f32 %v2225_v22, %v2742_v39 }
 0x58f   : > { %2226 = vrcp.f32 %v1300_v20 }
 0x595   : > { %v2227_v23 = vpop.eup %2226 }
 0x596   : > { %v1308_v26 = vmul.f32 %v2227_v23, %v2211_v43 }
 0x598   : > { %v1310_v27 = vpack.c.bf16 %v1308_v26, %v1307_v25 }
 0x5a6   : > { %v1204_v28 = vpop.permute.xlu1 %1203 }
 0x5a7   : > { %v1213_v29 = vsel %vm989_vm13, %v1204_v28, 0 }
 0x5a8   : > { %1221 = vmatpush.bf16.msrb.mxu1 %v1213_v29 }
 0x5ba   : > { %v1186_v21 = vpop.xlane.xlu0 %1185 }
 0x5bb   : > { %2228 = vrcp.f32 %v1186_v21 }
 0x5c1   : > { %v2229_v30 = vpop.eup %2228 }
 0x5c2   : > { %v1189_v36 = vpop.xlane.xlu2 %1188  ;;  %v1196_v32 = vmul.f32 %v2229_v30, %v2213_v53 }
 0x5c3   : > { %2230 = vrcp.f32 %v1189_v36 }
 0x5c9   : > { %v2231_v31 = vpop.eup %2230 }
 0x5ca   : > { %v1197_v41 = vmul.f32 %v2231_v31, %v2219_v61  ;;  %v1202_v33 = vpop.permute.xlu2 %1201 }
 0x5cb   : > { %1222 = vmatpush.bf16.msrb.mxu1 %v1202_v33 }
 0x5cc   : > { %v1199_v34 = vpack.c.bf16 %v1197_v41, %v1196_v32  ;;  %v2177_v41 = vld [vmem:[%s2991_s23] ss:$0 sm:$0xff] }
 0x5cd   : > { %v1315_v35 = vpop.permute.xlu0 %1314 }
 0x5ce   : > { %v1324_v37 = vsel %vm989_vm13, %v1315_v35, 0  ;;  %2004 = vmatmul.msk.bf16.vlgmr.msrb.gmra.mxu1 %vm942_vm14, %v1199_v34 }
 0x5cf   : > { %1332 = vmatpush.bf16.msra.mxu0 %v1324_v37 }
 0x5d0   : > { %v1113_v38 = vpop.f32.mrf.mxu0 }
 0x5d1   : > { %v1174_v39 = vpop.xlane.xlu1 %1173 }
 0x5d2   : > { %v1177_v40 = vsub.f32 %v1165_v8, %v1174_v39  ;;  %v2085_v8 = vld [vmem:[%s2541_s15 + $0x8] sm:$0xff] }
 0x5d3   : > { %1424 = vmatpush.bf16.msra.mxu2 %v2085_v8 }
 0x5d4   : > { %v1182_v42 = vmul.f32 1.442695, %v1177_v40 }
 0x5d6   : > { %2232 = vpow2.f32 %v1182_v42 }
 0x5d7   : > { %1425 = vmatpush.bf16.msra.mxu2 %v2084_v10 }
 0x5d8   : > { %v1115_v43 = vpop.f32.mrf.mxu0 }
 0x5d9   : > { %v2159_v44 = vpack.i.bf16 %v1115_v43, %v1113_v38 }
 0x5db   : > { %2160 = vrot.lane.b32.xlu2 %v2159_v44, %s2362_s16 }
 0x5dc   : > { %v2233_v45 = vpop.eup %2232 }
 0x5dd   : > { %v1190_v46 = vsel %vm942_vm14, %v2233_v45, 0.0 }
 0x5de   : > { %1191 = vadd.xlane.f32.xlu1 %v1190_v46 }
 0x5e9   : > { %v1313_v47 = vpop.permute.xlu1 %1312 }
 0x5ea   : > { %1333 = vmatpush.bf16.msra.mxu0 %v1313_v47 }
 0x5ed   : > { %2008 = vmatmul.msk.bf16.vlgmr.msra.gmra.mxu0 %vm942_vm14, %v1310_v27 }
 0x5ef   : > { %v1118_v49 = vpop.f32.mrf.mxu0 }
 0x5f7   : > { %v1120_v50 = vpop.f32.mrf.mxu0 }
 0x5f8   : > { %v1303_v51 = vpop.xlane.xlu0 %1302 }
 0x5f9   : > { %2234 = vrcp.f32 %v1303_v51 }
 0x5ff   : > { %v2235_v52 = vpop.eup %2234 }
 0x600   : > { %v1309_v53 = vmul.f32 %v2235_v52, %v2223_v24 }
 0x602   : > { %v1311_v55 = vpack.c.bf16 %v1309_v53, %v1309_v53 }
 0x604   : > { %2009 = vmatmul.msk.bf16.gmra.mxu0 %vm942_vm14, %v1311_v55 }
 0x635   : > { %v2161_v1 = vpop.permute.xlu2 %2160 }
 0x636   : > { %v2163_v13 = vunpack.i.h.bf16 %v2161_v1  ;;  %v2162_v14 = vunpack.i.l.bf16 %v2161_v1 }
 0x638   : > { %v1381_v24 = vsel %vm905_vm12, %v2726_v11, %v2163_v13  ;;  %v1380_v18 = vsel %vm905_vm12, %v2724_v9, %v2162_v14 }
 0x64b   : > { %v1224_v56 = vpop.f32.mrf.mxu1 }
 0x651   : > { %v1192_v57 = vpop.xlane.xlu1 %1191 }
 0x652   : > { %2236 = vrcp.f32 %v1192_v57 }
 0x653   : > { %v1226_v58 = vpop.f32.mrf.mxu1 }
 0x654   : > { %v2164_v59 = vpack.i.bf16 %v1226_v58, %v1224_v56  ;;  %v2087_v56 = vld [vmem:[%s2558_s4 + $0x8] sm:$0xff] }
 0x655   : > { %1553 = vmatpush.bf16.msra.mxu1 %v2087_v56 }
 0x656   : > { %2165 = vrot.lane.b32.xlu2 %v2164_v59, %s2363_s2  ;;  %v2086_v59 = vld [vmem:[%s2558_s4] sm:$0xff] }
 0x658   : > { %v2237_v60 = vpop.eup %2236 }
 0x659   : > { %v1198_v61 = vmul.f32 %v2237_v60, %v2233_v45  ;;  %1554 = vmatpush.bf16.msra.mxu1 %v2086_v59 }
 0x65b   : > { %v1200_v62 = vpack.c.bf16 %v1198_v61, %v1198_v61 }
 0x65d   : > { %2005 = vmatmul.msk.bf16.gmra.mxu1 %vm942_vm14, %v1200_v62 }
 0x66a   : > { %v1335_v63 = vpop.f32.mrf.mxu0 }
 0x672   : > { %v1337_v0 = vpop.f32.mrf.mxu0 }
 0x673   : > { %v2169_v2 = vpack.i.bf16 %v1337_v0, %v1335_v63 }
 0x675   : > { %2170 = vrot.lane.b32.xlu2 %v2169_v2, %s2364_s21 }
 0x67d   : > { %1351 = vrot.lane.b32.xlu2 %v1118_v49, %s2362_s16 }
 0x681   : > { %v1340_v5 = vpop.f32.mrf.mxu0 }
 0x685   : > { %1375 = vrot.lane.b32.xlu2 %v1340_v5, %s2364_s21 }
 0x689   : > { %v1342_v6 = vpop.f32.mrf.mxu0 }
 0x6b0   : > { %v2166_v54 = vpop.permute.xlu2 %2165 }
 0x6b1   : > { %v2168_v16 = vunpack.i.h.bf16 %v2166_v54  ;;  %v2167_v17 = vunpack.i.l.bf16 %v2166_v54 }
 0x6b3   : > { %v1385_v22 = vsel %vm1383_vm15, %v1381_v24, %v2168_v16  ;;  %v1384_v23 = vsel %vm1383_vm15, %v1380_v18, %v2167_v17 }
 0x6cf   : > { %v2171_v48 = vpop.permute.xlu2 %2170 }
 0x6d0   : > { %v2173_v19 = vunpack.i.h.bf16 %v2171_v48  ;;  %v2172_v20 = vunpack.i.l.bf16 %v2171_v48 }
 0x6d2   : > { %v1388_v25 = vsel %vm942_vm14, %v1385_v22, %v2173_v19  ;;  %v1387_v26 = vsel %vm942_vm14, %v1384_v23, %v2172_v20  ;;  %v2178_v20 = vld [vmem:[%s725_s14] ss:$0 sm:$0xff] }
 0x6d3   : > { %v1390_v27 = vpack.c.bf16 %v1388_v25, %v1387_v26 }
 0x6d5   : > { %2018 = vmatmul.msk.bf16.vlgmr.msra.gmra.mxu2 %vm765_vm1, %v1390_v27  ;;  %v2179_v27 = vld [vmem:[%s728_s18] ss:$0 sm:$0xff] }
 0x6d7   : > { %v1352_v29 = vpop.permute.xlu2 %1351 }
 0x6d8   : > { %v1382_v9 = vsel %vm905_vm12, %v2728_v12, %v1352_v29 }
 0x6da   : > { %v1229_v28 = vpop.f32.mrf.mxu1 }
 0x6db   : > { %1363 = vrot.lane.b32.xlu1 %v1229_v28, %s2363_s2 }
 0x6df   : > { %v1376_v36 = vpop.permute.xlu2 %1375 }
 0x6e2   : > { %v1231_v11 = vpop.f32.mrf.mxu1 }
 0x74d   : > { %v1364_v21 = vpop.permute.xlu1 %1363 }
 0x74e   : > { %v1386_v30 = vsel %vm1383_vm15, %v1382_v9, %v1364_v21 }
 0x74f   : > { %v1389_v31 = vsel %vm942_vm14, %v1386_v30, %v1376_v36 }
 0x750   : > { %v1391_v32 = vpack.c.bf16 %v1389_v31, %v1389_v31 }
 0x752   : > { %2019 = vmatmul.msk.bf16.gmra.mxu2 %vm765_vm1, %v1391_v32 }
 0x758   : > { %v1427_v33 = vpop.f32.mrf.mxu2 }
 0x759   : > { %v1428_v34 = vadd.f32 %v2177_v41, %v1427_v33 }
 0x75b   : > { %v2798_v35 = vadd.f32 %v1428_v34, %v2585_v3 }
 0x75d   : > { %v1441_v12 = vsel %vm765_vm1, %v2798_v35, 0.0 }
 0x75e   : > { %1442 = vadd.xlane.f32.xlu0 %v1441_v12 }
 0x760   : > { %v1429_v37 = vpop.f32.mrf.mxu2 }
 0x761   : > { %v1430_v38 = vadd.f32 %v2177_v41, %v1429_v37  ;;  %v2094_v37 = vld [vmem:[%s2568_s29 + $0x30] sm:$0xff] }
 0x763   : > { %v2803_v39 = vadd.f32 %v1430_v38, %v2593_v7 }
 0x765   : > { %v1444_v40 = vsel %vm765_vm1, %v2803_v39, 0.0 }
 0x766   : > { %1445 = vadd.xlane.f32.xlu2 %v1444_v40 }
 0x7d1   : > { %v1443_v42 = vpop.xlane.xlu0 %1442 }
 0x7d2   : > { %v1450_v44 = vmul.f32 %v1443_v42, %v2597_v15  ;;  %v2093_v42 = vld [vmem:[%s2568_s29 + $0x28] sm:$0xff] }
 0x7d4   : > { %v1453_v47 = vsub.f32 %v2798_v35, %v1450_v44 }
 0x7d5   : > { %v1432_v43 = vpop.f32.mrf.mxu2 }
 0x7d6   : > { %v1433_v3 = vadd.f32 %v2177_v41, %v1432_v43  ;;  %v1456_v53 = vmul.f32 %v1453_v47, %v1453_v47  ;;  %v2095_v41 = vld [vmem:[%s2568_s29 + $0x38] sm:$0xff] }
 0x7d7   : > { %1662 = vmatpush.bf16.msra.mxu3 %v2095_v41 }
 0x7d8   : > { %v2809_v45 = vadd.f32 %v1433_v3, %v2587_v4  ;;  %v1459_v4 = vsel %vm765_vm1, %v1456_v53, 0.0  ;;  %v2092_v3 = vld [vmem:[%s2568_s29 + $0x20] sm:$0xff] }
 0x7d9   : > { %v1446_v46 = vpop.xlane.xlu2 %1445  ;;  %v2088_v53 = vld [vmem:[%s2568_s29] sm:$0xff] }
 0x7da   : > { %v1451_v7 = vmul.f32 %v1446_v46, %v2597_v15  ;;  %v1447_v49 = vsel %vm765_vm1, %v2809_v45, 0.0 }
 0x7db   : > { %1448 = vadd.xlane.f32.xlu0 %v1447_v49  ;;  %1663 = vmatpush.bf16.msra.mxu3 %v2094_v37 }
 0x7dc   : > { %v1454_v50 = vsub.f32 %v2803_v39, %v1451_v7  ;;  %v2091_v7 = vld [vmem:[%s2568_s29 + $0x18] sm:$0xff] }
 0x7dd   : > { %v1434_v51 = vpop.f32.mrf.mxu2 }
 0x7de   : > { %v1457_v52 = vmul.f32 %v1454_v50, %v1454_v50 }
 0x7df   : > { %1664 = vmatpush.bf16.msra.mxu3 %v2093_v42 }
 0x7e0   : > { %v1462_v55 = vsel %vm765_vm1, %v1457_v52, 0.0  ;;  %v2089_v52 = vld [vmem:[%s2568_s29 + $0x8] sm:$0xff] }
 0x7e1   : > { %1463 = vadd.xlane.f32.xlu1 %v1462_v55  ;;  %v2180_v55 = vld [vmem:[%s736_s6] ss:$0 sm:$0xff] }
 0x7e3   : > { %1460 = vadd.xlane.f32.xlu0 %v1459_v4  ;;  %1665 = vmatpush.bf16.msra.mxu3 %v2092_v3 }
 0x7e7   : > { %1666 = vmatpush.bf16.msra.mxu3 %v2091_v7 }
 0x84e   : > { %v1449_v57 = vpop.xlane.xlu0 %1448 }
 0x84f   : > { %v1452_v58 = vmul.f32 %v1449_v57, %v2597_v15 }
 0x851   : > { %v2822_v60 = vsub.f32 %v2809_v45, %v1452_v58 }
 0x853   : > { %v1458_v61 = vmul.f32 %v2822_v60, %v2822_v60 }
 0x854   : > { %v1464_v62 = vpop.xlane.xlu1 %1463 }
 0x855   : > { %v1469_v63 = vmul.f32 %v1464_v62, %v2597_v15  ;;  %v1465_v0 = vsel %vm765_vm1, %v1458_v61, 0.0 }
 0x856   : > { %1466 = vadd.xlane.f32.xlu0 %v1465_v0  ;;  %v1461_v2 = vpop.xlane.xlu0 %1460 }
 0x857   : > { %v1472_v5 = vadd.f32 1e-05, %v1469_v63  ;;  %v1468_v6 = vmul.f32 %v1461_v2, %v2597_v15 }
 0x859   : > { %2238 = vrsqrt.f32 %v1472_v5  ;;  %v1471_v8 = vadd.f32 1e-05, %v1468_v6  ;;  %vm1490_vm2 = vweird.f32 %v1472_v5 }
 0x85b   : > { %2240 = vrsqrt.f32 %v1471_v8  ;;  %vm1480_vm5 = vweird.f32 %v1471_v8 }
 0x85f   : > { %v2239_v10 = vpop.eup %2238 }
 0x860   : > { %v1485_v1 = vmul.f32 %v2239_v10, %v1472_v5  ;;  %vm1491_vm0 = vweird.f32 %v2239_v10 }
 0x861   : > { %v2241_v54 = vpop.eup %2240  ;;  %vm1492_vm4 = vmor %vm1490_vm2, %vm1491_vm0 }
 0x862   : > { %v1486_v13 = vmul.f32 %v2239_v10, %v1485_v1  ;;  %v1475_v14 = vmul.f32 %v2241_v54, %v1471_v8  ;;  %vm1481_vm3 = vweird.f32 %v2241_v54 }
 0x863   : > { %vm1482_vm6 = vmor %vm1480_vm5, %vm1481_vm3 }
 0x864   : > { %v1487_v16 = vmul.f32 0.5, %v1486_v13  ;;  %v1476_v17 = vmul.f32 %v2241_v54, %v1475_v14 }
 0x866   : > { %v1488_v48 = vsub.f32 1.5, %v1487_v16  ;;  %v1477_v24 = vmul.f32 0.5, %v1476_v17 }
 0x868   : > { %v1489_v18 = vmul.f32 %v2239_v10, %v1488_v48  ;;  %v1478_v19 = vsub.f32 1.5, %v1477_v24 }
 0x86a   : > { %v1493_v22 = vsel %vm1492_vm4, %v2239_v10, %v1489_v18  ;;  %v1479_v23 = vmul.f32 %v2241_v54, %v1478_v19 }
 0x86b   : > { %v1505_v25 = vmul.f32 %v1493_v22, %v1454_v50  ;;  %v2090_v50 = vld [vmem:[%s2568_s29 + $0x10] sm:$0xff] }
 0x86c   : > { %v1483_v26 = vsel %vm1482_vm6, %v2241_v54, %v1479_v23  ;;  %1667 = vmatpush.bf16.msra.mxu3 %v2090_v50 }
 0x86d   : > { %v1511_v28 = vmul.f32 %v2178_v20, %v1505_v25  ;;  %v1504_v11 = vmul.f32 %v1483_v26, %v1453_v47 }
 0x86f   : > { %v1510_v29 = vmul.f32 %v2178_v20, %v1504_v11  ;;  %v1517_v9 = vadd.f32 %v2179_v27, %v1511_v28 }
 0x870   : > { %1668 = vmatpush.bf16.msra.mxu3 %v2089_v52 }
 0x871   : > { %v1516_v21 = vadd.f32 %v2179_v27, %v1510_v29 }
 0x873   : > { %v1519_v36 = vpack.c.bf16 %v1517_v9, %v1516_v21 }
 0x874   : > { %1669 = vmatpush.bf16.msra.mxu3 %v2088_v53 }
 0x875   : > { %2028 = vmatmul.msk.bf16.vlgmr.msra.gmra.mxu1 %vm765_vm1, %v1519_v36  ;;  %v2181_v36 = vld [vmem:[%s744_s27] ss:$0 sm:$0xff] }
 0x8c9   : > { %v1467_v30 = vpop.xlane.xlu0 %1466 }
 0x8ca   : > { %v1470_v31 = vmul.f32 %v1467_v30, %v2597_v15 }
 0x8cc   : > { %v1473_v32 = vadd.f32 1e-05, %v1470_v31 }
 0x8ce   : > { %2242 = vrsqrt.f32 %v1473_v32  ;;  %vm1500_vm8 = vweird.f32 %v1473_v32 }
 0x8d4   : > { %v2243_v33 = vpop.eup %2242 }
 0x8d5   : > { %v1495_v34 = vmul.f32 %v2243_v33, %v1473_v32  ;;  %vm1501_vm7 = vweird.f32 %v2243_v33 }
 0x8d6   : > { %vm1502_vm9 = vmor %vm1500_vm8, %vm1501_vm7 }
 0x8d7   : > { %v1496_v12 = vmul.f32 %v2243_v33, %v1495_v34 }
 0x8d9   : > { %v1497_v38 = vmul.f32 0.5, %v1496_v12 }
 0x8db   : > { %v1498_v40 = vsub.f32 1.5, %v1497_v38 }
 0x8dd   : > { %v1499_v43 = vmul.f32 %v2243_v33, %v1498_v40 }
 0x8df   : > { %v1503_v44 = vsel %vm1502_vm9, %v2243_v33, %v1499_v43 }
 0x8e0   : > { %v1506_v46 = vmul.f32 %v1503_v44, %v2822_v60 }
 0x8e2   : > { %v1512_v47 = vmul.f32 %v2178_v20, %v1506_v46 }
 0x8e4   : > { %v1518_v49 = vadd.f32 %v2179_v27, %v1512_v47 }
 0x8e6   : > { %v1520_v51 = vpack.c.bf16 %v1518_v49, %v1518_v49 }
 0x8e8   : > { %2029 = vmatmul.msk.bf16.gmra.mxu1 %vm765_vm1, %v1520_v51 }
 0x8f2   : > { %v1556_v4 = vpop.f32.mrf.mxu1 }
 0x8f3   : > { %v1557_v56 = vadd.f32 %v2180_v55, %v1556_v4 }
 0x8f5   : > { %v1568_v57 = vmul.f32 0.044715, %v1557_v56  ;;  %v1565_v13 = vmul.f32 0.5, %v1557_v56 }
 0x8f7   : > { %v1571_v58 = vmul.f32 %v1568_v57, %v1557_v56 }
 0x8f9   : > { %v1574_v59 = vmul.f32 %v1571_v58, %v1557_v56 }
 0x8fa   : > { %v1558_v60 = vpop.f32.mrf.mxu1 }
 0x8fb   : > { %v1577_v61 = vadd.f32 %v1574_v59, %v1557_v56  ;;  %v1559_v62 = vadd.f32 %v2180_v55, %v1558_v60 }
 0x8fd   : > { %v1569_v63 = vmul.f32 0.044715, %v1559_v62  ;;  %v1580_v0 = vmul.f32 0.7978846, %v1577_v61  ;;  %v1566_v14 = vmul.f32 0.5, %v1559_v62 }
 0x8ff   : > { %v1572_v2 = vmul.f32 %v1569_v63, %v1559_v62  ;;  %2244 = vtanh.f32 %v1580_v0 }
 0x901   : > { %v1575_v5 = vmul.f32 %v1572_v2, %v1559_v62 }
 0x903   : > { %v1578_v6 = vadd.f32 %v1575_v5, %v1559_v62 }
 0x905   : > { %v1581_v8 = vmul.f32 0.7978846, %v1578_v6  ;;  %v2245_v10 = vpop.eup %2244 }
 0x906   : > { %v1586_v1 = vadd.f32 1.0, %v2245_v10 }
 0x907   : > { %2246 = vtanh.f32 %v1581_v8 }
 0x908   : > { %v1589_v17 = vmul.f32 %v1586_v1, %v1565_v13 }
 0x90d   : > { %v2247_v54 = vpop.eup %2246 }
 0x90e   : > { %v1587_v16 = vadd.f32 1.0, %v2247_v54 }
 0x910   : > { %v1590_v48 = vmul.f32 %v1587_v16, %v1566_v14 }
 0x912   : > { %v1592_v24 = vpack.c.bf16 %v1590_v48, %v1589_v17 }
 0x914   : > { %1670 = vmatmul.bf16.vlgmr.msra.gmra.mxu3 %v1592_v24 }
 0x965   : > { %v1561_v18 = vpop.f32.mrf.mxu1 }
 0x966   : > { %v1562_v19 = vadd.f32 %v2180_v55, %v1561_v18 }
 0x968   : > { %v1570_v20 = vmul.f32 0.044715, %v1562_v19  ;;  %v1567_v11 = vmul.f32 0.5, %v1562_v19 }
 0x96a   : > { %v1573_v22 = vmul.f32 %v1570_v20, %v1562_v19 }
 0x96c   : > { %v1576_v23 = vmul.f32 %v1573_v22, %v1562_v19 }
 0x96d   : > { %v1563_v25 = vpop.f32.mrf.mxu1 }
 0x96e   : > { %v1579_v26 = vadd.f32 %v1576_v23, %v1562_v19 }
 0x970   : > { %v1582_v27 = vmul.f32 0.7978846, %v1579_v26 }
 0x972   : > { %2248 = vtanh.f32 %v1582_v27 }
 0x978   : > { %v2249_v28 = vpop.eup %2248 }
 0x979   : > { %v1588_v29 = vadd.f32 1.0, %v2249_v28 }
 0x97b   : > { %v1591_v9 = vmul.f32 %v1588_v29, %v1567_v11 }
 0x97d   : > { %v1593_v21 = vpack.c.bf16 %v1591_v9, %v1591_v9 }
 0x97f   : > { %1675 = vmatmul.bf16.gmra.mxu3 %v1593_v21 }
 0x997   : > { %v1671_v30 = vpop.f32.mrf.mxu3 }
 0x998   : > { %v1672_v31 = vadd.f32 %v2181_v36, %v1671_v30 }
 0x99a   : > { %v1680_v32 = vadd.f32 %v1672_v31, %v2798_v35 }
 0x99c   : > { %1683 = vst.msk [vmem:[#allocation2] sm:$0xff] %vm765_vm1, %v1680_v32 }
 0x99f   : > { %v1673_v41 = vpop.f32.mrf.mxu3 }
 0x9a0   : > { %v1674_v33 = vadd.f32 %v2181_v36, %v1673_v41 }
 0x9a2   : > { %v1681_v34 = vadd.f32 %v1674_v33, %v2803_v39 }
 0x9a4   : > { %1684 = vst.msk [vmem:[#allocation2 + $0x8] sm:$0xff] %vm765_vm1, %v1681_v34 }
 0xa02   : > { %v1676_v12 = vpop.f32.mrf.mxu3 }
 0xa03   : > { %v1677_v37 = vadd.f32 %v2181_v36, %v1676_v12 }
 0xa05   : > { %v1682_v38 = vadd.f32 %v1677_v37, %v2809_v45 }
 0xa06   : > { %1693 = sbr.rel (%p2062_p12) target bundleno = 2975 (0xb9f), region = 96 }
 0xa07   : > { %1685 = vst.msk [vmem:[#allocation2 + $0x10] sm:$0xff] %vm765_vm1, %v1682_v38  ;;  %v1687_v40 = vsel %vm1686_vm10, %v1681_v34, %v1682_v38 }
 0xa08   : > { %1689 = vst.msk [vmem:[%s700_s30] sm:$0x3] %vm1688_vm11, %v1687_v40 }
 0xa0a   : > { %v1678_v35 = vpop.f32.mrf.mxu3 }
 0xa0b   : > { %v1696_v42 = vsel %vm1688_vm11, %v1687_v40, 0.0  ;;  %v2097_v45 = vld [vmem:[%s2992_s22 + $0x8] sm:$0xff]  ;;  %v2096_v47 = vld [vmem:[%s2992_s22] sm:$0xff]  ;;  %vm1759_vm15 = vcmask 123904  }
 0xa0c   : > { %1697 = vadd.xlane.f32.xlu0 %v1696_v42  ;;  %1752 = vmatpush.bf16.msra.mxu0 %v2097_v45  ;;  %v2250_v57 = vld [vmem:[%s2993_s1] ss:$0 sm:$0xff] }
 0xa10   : > { %1753 = vmatpush.bf16.msra.mxu0 %v2096_v47 }
 0xa7f   : > { %v1698_v39 = vpop.xlane.xlu0 %1697 }
 0xa80   : > { %v1699_v43 = vmul.f32 %v1698_v39, %v2597_v15 }
 0xa82   : > { %v1700_v44 = vsub.f32 %v1687_v40, %v1699_v43 }
 0xa84   : > { %v1701_v3 = vmul.f32 %v1700_v44, %v1700_v44 }
 0xa86   : > { %v1702_v46 = vsel %vm1688_vm11, %v1701_v3, 0.0 }
 0xa87   : > { %1703 = vadd.xlane.f32.xlu0 %v1702_v46 }
 0xafa   : > { %v1704_v7 = vpop.xlane.xlu0 %1703 }
 0xafb   : > { %v1705_v49 = vmul.f32 %v1704_v7, %v2597_v15  ;;  %v2251_v15 = vld [vmem:[%s2994_s19] ss:$0 sm:$0xff] }
 0xafd   : > { %v1706_v50 = vadd.f32 1e-05, %v1705_v49 }
 0xaff   : > { %2252 = vrsqrt.f32 %v1706_v50  ;;  %vm1713_vm13 = vweird.f32 %v1706_v50 }
 0xb05   : > { %v2253_v51 = vpop.eup %2252 }
 0xb06   : > { %v1708_v52 = vmul.f32 %v2253_v51, %v1706_v50  ;;  %vm1714_vm12 = vweird.f32 %v2253_v51 }
 0xb07   : > { %vm1715_vm14 = vmor %vm1713_vm13, %vm1714_vm12 }
 0xb08   : > { %v1709_v53 = vmul.f32 %v2253_v51, %v1708_v52 }
 0xb0a   : > { %v1710_v55 = vmul.f32 0.5, %v1709_v53 }
 0xb0c   : > { %v1711_v4 = vsub.f32 1.5, %v1710_v55 }
 0xb0e   : > { %v1712_v56 = vmul.f32 %v2253_v51, %v1711_v4 }
 0xb10   : > { %v1716_v58 = vsel %vm1715_vm14, %v2253_v51, %v1712_v56 }
 0xb11   : > { %v1717_v59 = vmul.f32 %v1716_v58, %v1700_v44 }
 0xb13   : > { %v1721_v60 = vmul.f32 %v2250_v57, %v1717_v59 }
 0xb15   : > { %v1725_v61 = vadd.f32 %v2251_v15, %v1721_v60 }
 0xb17   : > { %v1726_v62 = vpack.c.bf16 %v1725_v61, %v1725_v61 }
 0xb19   : > { %2071 = vmatmul.msk.bf16.vlgmr.msra.gmra.mxu0 %vm765_vm1, %v1726_v62 }
 0xb96   : > { %v1755_v63 = vpop.f32.mrf.mxu0 }
 0xb97   : > { %1760 = vst.msk [vmem:[#allocation3] sm:$0x3] %vm1759_vm15, %v1755_v63 }
 0xb9e   : > { %v1757_v0 = vpop.f32.mrf.mxu0 }
 0xb9f PF: > { %s2995_s14 = sld [smem:[#allocation25_spill]]  ;;  %s2365_s29 = smov [#allocation3]  }
 0xba0   : > { %s2996_s18 = sld [smem:[#allocation10_spill]]  ;;  %s1772_s27 = sshll.u32 %s2365_s29, 4  ;;  %s1773_s27 = int_to_ptr.vmem [resolvable:$true] %s1772_s27 }
 0xba1   : > { %s2074_s16 = sshll.u32 %s2482_s0, 1  ;;  %s1786_s2 = sshll.u32 %s700_s30, 4  ;;  %s1787_s2 = int_to_ptr.vmem [resolvable:$true] %s1786_s2 }
 0xba2   : > { %s2998_s1 = sld [smem:[#allocation26_spill]] }
 0xba5   : > { %s1774_s6 = sshll.u32 %s2995_s14, 4  ;;  %s1775_s6 = int_to_ptr.hbm [resolvable:$true] %s1774_s6 }
 0xba6   : > { %2099 = dma.vmem_to_hbm [thread:$0]  (%p489_p2), %s1773_s27, 32, %s1775_s6, [#allocation4]  }
 0xba7   : > { %s2999_s19 = sand.u32 1, %s2996_s18  }
 0xba8   : > { %s1784_s23 = scalar_lea.hbm %s2998_s1, %s2074_s16  ;;  %s1762_s24 = scalar_lea.sflag [#allocation6], %s2999_s19 }
 0xba9   : > { %s1788_s4 = sshll.u32 %s1784_s23, 4  ;;  %s2302_s25 = scalar_lea.hbm %s2998_s1, 4  ;;  %s1789_s4 = int_to_ptr.hbm [resolvable:$true] %s1788_s4 }
 0xbaa   : > { %s2296_s28 = sshra.s32 %s1789_s4, 4  ;;  %s2297_s28 = int_to_ptr.hbm [resolvable:$true] %s2296_s28 }
 0xbab   : > { %s2298_s14 = scalar_lea.hbm %s2297_s28, 2  ;;  %p2303_p3 = scmp.lt.s32.totalorder %s2297_s28, %s2998_s1 }
 0xbac   : > { %p2299_p13 = scmp.ne.s32.totalorder %s2297_s28, %s2298_s14  ;;  %p2304_p4 = scmp.lt.s32.totalorder %s2302_s25, %s2298_s14 }
 0xbae   : > { %p2300_p0 = pnand %p2299_p13, %p2501_p5  ;;  %p2305_p7 = por %p2304_p4, %p2303_p3 }
 0xbb0   : > { %p2301_p1 = pneg %p2300_p0 }
 0xbb2   : > { %p2306_p8 = pnand %p2305_p7, %p2301_p1 }
 0xbb4   : > { %2309 = shalt.err (!%p2306_p8)
}
 0xbb5   : > { %2100 = dma.vmem_to_hbm [thread:$0]  (%p2501_p5), %s1787_s2, 32, %s1789_s4, %s1762_s24  }
 0xbb6   : > { %2327 = dma.done.wait (%p489_p2), [#allocation4], 32  }
 0xbb7   : > { %2329 = vsyncadd (%p489_p2), [#allocation4], 4294967264 }
 0xbb8 PF: > { %s3000_s18 = sld [smem:[#allocation12_spill]] }
 0xbb9   : > { %s3001_s16 = sld [smem:[#allocation9_spill]] }
 0xbbe   : > { %p2110_p9 = scmp.ge.s32.totalorder %s3000_s18, 2 }
 0xbbf   : > { %s1805_s15 = sand.u32 1, %s3001_s16  }
 0xbc0   : > { %p2105_p10 = pnand %p2110_p9, %p2505_p6  ;;  %s1806_s23 = scalar_lea.sflag [#allocation6], %s1805_s15 }
 0xbc2   : > { %p2106_p11 = pneg %p2105_p10 }
 0xbc4   : > { %2331 = dma.done.wait (%p2106_p11), %s1806_s23, 32  }
 0xbc5   : > { %2333 = vsyncadd (%p2106_p11), %s1806_s23, 4294967264  ;;  %s3003_s30 = sld [smem:[#allocation13_spill]] }
 0xbc6   : > { %s3004_s27 = sld [smem:[#allocation10_spill]] }
 0xbc7   : > { %s3005_s28 = sld [smem:[#allocation11_spill]] }
 0xbc8   : > { %s3006_s29 = sld [smem:[#allocation14_spill]] }
 0xbcb   : > { %p30_p5 = scmp.ge.s32.totalorder %s3003_s30, 4  }
 0xbcd   :  { %32 = sbr.rel (!%p30_p5) target bundleno = 15 (0xf), region = 173 }
 0xbd2   :  { %1812 = vsyncpa [#allocation4], 1 }
 0xbd3   :  { %1814 = vsyncpa [#allocation4 + $0x1], 1 }
 0xbd4   :  { %1815 = vsyncpa [#allocation6], 1 }
 0xbd5   :  { %1817 = vsyncpa [#allocation6 + $0x1], 1 }

</bundles_post_ra>
